<compile_context>
chip_gen: v7x
topology: tpu7x:2x2x1
jax: 0.10.0
libtpu: 0.0.40
codegen_flags: <defaults>
</compile_context>

<pallas_src>
import functools

import jax
import jax.numpy as jnp
from jax.experimental import pallas as pl
from jax.experimental.pallas import tpu as pltpu

EPS = 1e-5


def fused_kernel(x_ref, mask_ref, w1f_ref, g1_ref, be1_ref, bsk_ref,
                 w2_ref, g2_ref, be2_ref, wt_ref, bt_ref,
                 out_ref,
                 slab_ref, stage_ref,
                 *, N, H, W, Cin, G):
    f32 = jnp.float32
    bf16 = jnp.bfloat16
    Wp, Hp = W + 2, H + 2
    Mp = N * Hp * Wp
    inv_count = 1.0 / float(N * H * W)

    mask = mask_ref[...]                       # (1, Mp) interior-pixel indicator, f32

    def bn_train(y, gamma, beta):
        # Training-mode BatchNorm over the interior columns of a (C, Mp) slab
        # (biased variance, matching torch.nn.BatchNorm2d in train mode).
        mean = jnp.sum(y * mask, axis=1, keepdims=True) * inv_count
        c = (y - mean) * mask
        var = jnp.sum(c * c, axis=1, keepdims=True) * inv_count
        return (y - mean) * jax.lax.rsqrt(var + EPS) * gamma + beta

    # Zero the guard bands of the staging buffer once: keeps the (ignored)
    # halo columns finite so the masked BN sums stay NaN-free.
    stage_ref[:, :G] = jnp.zeros((Cin, G), bf16)
    stage_ref[:, G + Mp:] = jnp.zeros((Cin, G), bf16)

    taps9 = [(ky, kx) for ky in range(3) for kx in range(3)]

    # ---- conv1 (3x3) + fused 1x1 skip: build im2col slab, ONE MXU matmul -----
    # Each tap is a contiguous lane-slice of the padded-flat input.
    for t, (ky, kx) in enumerate(taps9):
        s = (ky - 1) * Wp + (kx - 1)
        slab_ref[t * Cin:(t + 1) * Cin, :] = x_ref[:, G + s:G + s + Mp]
    y = jnp.dot(w1f_ref[...], slab_ref[...],
                preferred_element_type=f32)                     # (2*Cin, Mp)
    skip = y[Cin:, :] + bsk_ref[...]                            # 1x1 skip path
    # bn1 + ReLU (conv bias b1 dropped: exact no-op before train-mode BN)
    h = jnp.maximum(bn_train(y[:Cin, :], g1_ref[...], be1_ref[...]), 0.0)

    # ---- stage h (halo columns zeroed via mask), conv2 the same way ----------
    stage_ref[:, G:G + Mp] = (h * mask).astype(bf16)
    for t, (ky, kx) in enumerate(taps9):
        s = (ky - 1) * Wp + (kx - 1)
        slab_ref[t * Cin:(t + 1) * Cin, :] = stage_ref[:, G + s:G + s + Mp]
    y2 = jnp.dot(w2_ref[...], slab_ref[...],
                 preferred_element_type=f32)                    # (Cin, Mp)
    y2 = bn_train(y2, g2_ref[...], be2_ref[...])                # conv bias b2 dropped

    # ---- residual add + outer ReLU -------------------------------------------
    g = jnp.maximum(y2 + skip, 0.0)

    # ---- ConvTranspose2d(k=3, s=2, p=1) as ONE matmul over the 2x2 input taps -
    stage_ref[:, G:G + Mp] = (g * mask).astype(bf16)
    for t, (dy, dx) in enumerate([(0, 0), (0, 1), (1, 0), (1, 1)]):
        s = dy * Wp + dx
        slab_ref[t * Cin:(t + 1) * Cin, :] = stage_ref[:, G + s:G + s + Mp]
    yt = jnp.dot(wt_ref[...], slab_ref[:4 * Cin, :],
                 preferred_element_type=f32) + bt_ref[...]      # (4*Cout, Mp)
    out_ref[...] = yt


def resnet_block_with_upsample_pallas(x_nchw, params):
    """x_nchw: (N, Cin, H, W) float32 -> (N, Cout, 2H-1, 2W-1) float32."""
    N, Cin, H, W = x_nchw.shape
    Cout = params["wt"].shape[1]
    f32, bf16 = jnp.float32, jnp.bfloat16
    Wp, Hp = W + 2, H + 2
    Mp = N * Hp * Wp
    G = 128                                    # guard band (>= W + 3)

    # channel-major padded-flat input (pure layout glue, reads x once)
    xc = jnp.transpose(x_nchw, (1, 0, 2, 3)).astype(f32)        # (Cin, N, H, W)
    xp = jnp.pad(xc, ((0, 0), (0, 0), (1, 1), (1, 1)))          # (Cin, N, Hp, Wp)
    x_flat = jnp.pad(xp.reshape(Cin, Mp), ((0, 0), (G, G))).astype(bf16)

    # interior-pixel indicator over the padded-flat column axis
    mask = jnp.pad(jnp.ones((N, H, W), f32),
                   ((0, 0), (1, 1), (1, 1))).reshape(1, Mp)

    # conv1 weights (HWIO) -> (Cout_rows, 9*Cin) with the 1x1 skip fused as rows
    w1_rows = params["w1"].reshape(9 * Cin, Cin)                # row = tap*Cin + cin
    w1f_T = jnp.zeros((2 * Cin, 9 * Cin), f32)
    w1f_T = w1f_T.at[:Cin, :].set(w1_rows.T)
    w1f_T = w1f_T.at[Cin:, 4 * Cin:5 * Cin].set(params["wsk"].T)   # center tap only
    w1f_T = w1f_T.astype(bf16)                                  # (2*Cin, 9*Cin)
    w2_T = params["w2"].reshape(9 * Cin, Cin).T.astype(bf16)    # (Cin, 9*Cin)

    # Pack ConvTranspose2d weights (Cin, Cout, 3, 3) into (4*Cout, 4*Cin):
    # cols = 2x2 input taps [x00|x01|x10|x11], rows = parities [p00;p01;p10;p11],
    # out[2a+py, 2b+px] = sum of the listed taps (stride-2 transposed conv).
    wt = params["wt"].astype(f32)
    Wk = lambda ky, kx: wt[:, :, ky, kx]                        # (Cin, Cout)
    Z = jnp.zeros((Cin, Cout), f32)
    wt_packed = jnp.concatenate([
        jnp.concatenate([Wk(1, 1), Wk(1, 2), Wk(2, 1), Wk(2, 2)], axis=1),  # x00
        jnp.concatenate([Z,        Wk(1, 0), Z,        Wk(2, 0)], axis=1),  # x01
        jnp.concatenate([Z,        Z,        Wk(0, 1), Wk(0, 2)], axis=1),  # x10
        jnp.concatenate([Z,        Z,        Z,        Wk(0, 0)], axis=1),  # x11
    ], axis=0)                                                  # (4*Cin, 4*Cout)
    wt_T = wt_packed.T.astype(bf16)                             # (4*Cout, 4*Cin)
    bt_rows = jnp.tile(params["bt"].reshape(Cout, 1), (4, 1)).astype(f32)   # (4*Cout,1)

    g1 = params["g1"].reshape(Cin, 1).astype(f32)
    be1 = params["be1"].reshape(Cin, 1).astype(f32)
    g2 = params["g2"].reshape(Cin, 1).astype(f32)
    be2 = params["be2"].reshape(Cin, 1).astype(f32)
    bsk = params["bsk"].reshape(Cin, 1).astype(f32)

    inputs = (x_flat, mask, w1f_T, g1, be1, bsk, w2_T, g2, be2, wt_T, bt_rows)

    out_bytes = 4 * Cout * Mp * 4
    in_bytes = sum(int(a.size) * a.dtype.itemsize for a in inputs)
    scratch_bytes = (9 * Cin * Mp + Cin * (Mp + 2 * G)) * 2
    flops = 2 * Mp * (2 * Cin * 9 * Cin + Cin * 9 * Cin + 4 * Cout * 4 * Cin)
    cost = pl.CostEstimate(flops=flops, transcendentals=4 * Cin,
                           bytes_accessed=in_bytes + out_bytes)
    vmem_limit = int(min(100 * 1024 * 1024,
                         max(8 * 1024 * 1024,
                             4 * (in_bytes + out_bytes + scratch_bytes))))

    kernel = functools.partial(fused_kernel, N=N, H=H, W=W, Cin=Cin, G=G)
    vspec = pl.BlockSpec(memory_space=pltpu.MemorySpace.VMEM)

    yt = pl.pallas_call(
        kernel,
        out_shape=jax.ShapeDtypeStruct((4 * Cout, Mp), f32),
        in_specs=[vspec] * len(inputs),
        out_specs=vspec,
        scratch_shapes=[
            pltpu.VMEM((9 * Cin, Mp), bf16),           # shared im2col / tap slab
            pltpu.VMEM((Cin, Mp + 2 * G), bf16),       # padded-flat activation staging
        ],
        compiler_params=pltpu.CompilerParams(vmem_limit_bytes=vmem_limit),
        cost_estimate=cost,
    )(*inputs)

    # Parity interleave + halo crop of the transposed-conv output (layout glue).
    y = yt.reshape(2, 2, Cout, N, Hp, Wp)[:, :, :, :, 1:H + 1, 1:W + 1]
    y = jnp.transpose(y, (3, 2, 4, 0, 5, 1)).reshape(N, Cout, 2 * H, 2 * W)
    return y[:, :, :2 * H - 1, :2 * W - 1]                      # NCHW


# ---------------------------------------------------------------------------
# Pure-JAX f32 reference mirroring the PyTorch module (for correctness check).
# ---------------------------------------------------------------------------
def _conv3x3_ref(x_nhwc, w_hwio, b):
    y = jax.lax.conv_general_dilated(
        x_nhwc, w_hwio, window_strides=(1, 1), padding="SAME",
        dimension_numbers=("NHWC", "HWIO", "NHWC"))
    return y + b.reshape(1, 1, 1, -1)


def _bn_ref(y_nhwc, gamma, beta):
    mean = jnp.mean(y_nhwc, axis=(0, 1, 2), keepdims=True)
    var = jnp.mean((y_nhwc - mean) ** 2, axis=(0, 1, 2), keepdims=True)
    inv = jax.lax.rsqrt(var + EPS)
    return (y_nhwc - mean) * inv * gamma.reshape(1, 1, 1, -1) \
        + beta.reshape(1, 1, 1, -1)


def _convtranspose_ref(x_nhwc, wt_iokk, b):
    # PyTorch ConvTranspose2d(k=3, stride=2, padding=1, output_padding=0):
    # dilate input by 2, pad by (k-1-p)=1, cross-correlate with flipped kernel.
    w = jnp.transpose(wt_iokk, (2, 3, 0, 1))[::-1, ::-1, :, :]   # flipped HWIO
    y = jax.lax.conv_general_dilated(
        x_nhwc, w, window_strides=(1, 1), padding=((1, 1), (1, 1)),
        lhs_dilation=(2, 2), dimension_numbers=("NHWC", "HWIO", "NHWC"))
    return y + b.reshape(1, 1, 1, -1)


def resnet_block_with_upsample_ref(x_nchw, p):
    x = jnp.transpose(x_nchw, (0, 2, 3, 1)).astype(jnp.float32)
    res = x
    y = _conv3x3_ref(x, p["w1"], p["b1"].reshape(-1))
    y = _bn_ref(y, p["g1"].reshape(-1), p["be1"].reshape(-1))
    y = jnp.maximum(y, 0.0)
    y = _conv3x3_ref(y, p["w2"], p["b2"].reshape(-1))
    y = _bn_ref(y, p["g2"].reshape(-1), p["be2"].reshape(-1))
    skip = jnp.einsum("nhwc,co->nhwo", res, p["wsk"]) + p["bsk"].reshape(1, 1, 1, -1)
    y = y + skip
    y = jnp.maximum(y, 0.0)                       # outer activation (ReLU)
    y = _convtranspose_ref(y, p["wt"], p["bt"].reshape(-1))
    return jnp.transpose(y, (0, 3, 1, 2))


def make_params(key, in_channels, out_channels):
    ks = jax.random.split(key, 12)
    f32 = jnp.float32
    c = in_channels
    n = jax.random.normal
    return {
        # conv weights stored HWIO (3, 3, Cin, Cout) for the NHWC math
        "w1": 0.1 * n(ks[0], (3, 3, c, c), f32),
        "b1": 0.1 * n(ks[1], (1, c), f32),
        "g1": 1.0 + 0.1 * n(ks[2], (1, c), f32),
        "be1": 0.1 * n(ks[3], (1, c), f32),
        "w2": 0.1 * n(ks[4], (3, 3, c, c), f32),
        "b2": 0.1 * n(ks[5], (1, c), f32),
        "g2": 1.0 + 0.1 * n(ks[6], (1, c), f32),
        "be2": 0.1 * n(ks[7], (1, c), f32),
        "wsk": 0.1 * n(ks[8], (c, c), f32),
        "bsk": 0.1 * n(ks[9], (1, c), f32),
        # ConvTranspose2d weight in PyTorch layout (Cin, Cout, kH, kW) + bias
        "wt": 0.1 * n(ks[10], (c, out_channels, 3, 3), f32),
        "bt": 0.1 * n(ks[11], (1, out_channels), f32),
    }


if __name__ == "__main__":
    key = jax.random.PRNGKey(0)
    k_x, k_p = jax.random.split(key)

    N, Cin, Cout, H, W = 2, 4, 8, 16, 16
    x = jax.random.normal(k_x, (N, Cin, H, W), jnp.float32)
    params = make_params(k_p, Cin, Cout)

    out = jax.block_until_ready(resnet_block_with_upsample_pallas(x, params))
    ref = jax.block_until_ready(resnet_block_with_upsample_ref(x, params))

    assert out.shape == (N, Cout, 2 * H - 1, 2 * W - 1), out.shape
    max_err = float(jnp.max(jnp.abs(out - ref)))
    # bf16 matmul operands vs. the f32 reference -> small quantization noise.
    assert jnp.allclose(out, ref, rtol=5e-2, atol=5e-2), f"max abs err = {max_err}"

    print("KERNEL_OK")
</pallas_src>

<mosaic_0001>
module attributes {stable_mosaic.version = 11 : i64} {
  func.func @fused_kernel(%arg0: memref<4x904xbf16, #tpu.memory_space<vmem>>, %arg1: memref<1x648xf32, #tpu.memory_space<vmem>>, %arg2: memref<8x36xbf16, #tpu.memory_space<vmem>>, %arg3: memref<4x1xf32, #tpu.memory_space<vmem>>, %arg4: memref<4x1xf32, #tpu.memory_space<vmem>>, %arg5: memref<4x1xf32, #tpu.memory_space<vmem>>, %arg6: memref<4x36xbf16, #tpu.memory_space<vmem>>, %arg7: memref<4x1xf32, #tpu.memory_space<vmem>>, %arg8: memref<4x1xf32, #tpu.memory_space<vmem>>, %arg9: memref<32x16xbf16, #tpu.memory_space<vmem>>, %arg10: memref<32x1xf32, #tpu.memory_space<vmem>>, %arg11: memref<32x648xf32, #tpu.memory_space<vmem>>, %arg12: memref<36x648xbf16, #tpu.memory_space<vmem>>, %arg13: memref<4x904xbf16, #tpu.memory_space<vmem>>) attributes {dimension_semantics = [], scalar_prefetch = 0 : i64, scratch_operands = 2 : i64, tpu.core_type = #tpu.core_type<tc>} {
    %c0 = arith.constant 0 : index
    %c0_0 = arith.constant 0 : index
    %0 = vector.load %arg1[%c0, %c0_0] : memref<1x648xf32, #tpu.memory_space<vmem>>, vector<1x648xf32>
    %cst = arith.constant 0.000000e+00 : bf16
    %1 = vector.broadcast %cst : bf16 to vector<4x128xbf16>
    %c0_1 = arith.constant 0 : index
    %c0_2 = arith.constant 0 : index
    %2 = vector.load %arg13[%c0_1, %c0_2] : memref<4x904xbf16, #tpu.memory_space<vmem>>, vector<4x128xbf16>
    tpu.vector_store %arg13[%c0_1, %c0_2], %1 {strides = array<i32>} : memref<4x904xbf16, #tpu.memory_space<vmem>>, vector<4x128xbf16>,
    %cst_3 = arith.constant 0.000000e+00 : bf16
    %3 = vector.broadcast %cst_3 : bf16 to vector<4x128xbf16>
    %c0_4 = arith.constant 0 : index
    %c776 = arith.constant 776 : index
    %4 = vector.load %arg13[%c0_4, %c776] : memref<4x904xbf16, #tpu.memory_space<vmem>>, vector<4x128xbf16>
    tpu.vector_store %arg13[%c0_4, %c776], %3 {strides = array<i32>} : memref<4x904xbf16, #tpu.memory_space<vmem>>, vector<4x128xbf16>,
    %c0_5 = arith.constant 0 : index
    %c109 = arith.constant 109 : index
    %5 = vector.load %arg0[%c0_5, %c109] : memref<4x904xbf16, #tpu.memory_space<vmem>>, vector<4x648xbf16>
    %c0_6 = arith.constant 0 : index
    %c0_7 = arith.constant 0 : index
    %6 = vector.load %arg12[%c0_6, %c0_7] : memref<36x648xbf16, #tpu.memory_space<vmem>>, vector<4x648xbf16>
    tpu.vector_store %arg12[%c0_6, %c0_7], %5 {strides = array<i32>} : memref<36x648xbf16, #tpu.memory_space<vmem>>, vector<4x648xbf16>,
    %c0_8 = arith.constant 0 : index
    %c110 = arith.constant 110 : index
    %7 = vector.load %arg0[%c0_8, %c110] : memref<4x904xbf16, #tpu.memory_space<vmem>>, vector<4x648xbf16>
    %c4 = arith.constant 4 : index
    %c0_9 = arith.constant 0 : index
    %8 = vector.load %arg12[%c4, %c0_9] : memref<36x648xbf16, #tpu.memory_space<vmem>>, vector<4x648xbf16>
    tpu.vector_store %arg12[%c4, %c0_9], %7 {strides = array<i32>} : memref<36x648xbf16, #tpu.memory_space<vmem>>, vector<4x648xbf16>,
    %c0_10 = arith.constant 0 : index
    %c111 = arith.constant 111 : index
    %9 = vector.load %arg0[%c0_10, %c111] : memref<4x904xbf16, #tpu.memory_space<vmem>>, vector<4x648xbf16>
    %c8 = arith.constant 8 : index
    %c0_11 = arith.constant 0 : index
    %10 = vector.load %arg12[%c8, %c0_11] : memref<36x648xbf16, #tpu.memory_space<vmem>>, vector<4x648xbf16>
    tpu.vector_store %arg12[%c8, %c0_11], %9 {strides = array<i32>} : memref<36x648xbf16, #tpu.memory_space<vmem>>, vector<4x648xbf16>,
    %c0_12 = arith.constant 0 : index
    %c127 = arith.constant 127 : index
    %11 = vector.load %arg0[%c0_12, %c127] : memref<4x904xbf16, #tpu.memory_space<vmem>>, vector<4x648xbf16>
    %c12 = arith.constant 12 : index
    %c0_13 = arith.constant 0 : index
    %12 = vector.load %arg12[%c12, %c0_13] : memref<36x648xbf16, #tpu.memory_space<vmem>>, vector<4x648xbf16>
    tpu.vector_store %arg12[%c12, %c0_13], %11 {strides = array<i32>} : memref<36x648xbf16, #tpu.memory_space<vmem>>, vector<4x648xbf16>,
    %c0_14 = arith.constant 0 : index
    %c128 = arith.constant 128 : index
    %13 = vector.load %arg0[%c0_14, %c128] : memref<4x904xbf16, #tpu.memory_space<vmem>>, vector<4x648xbf16>
    %c16 = arith.constant 16 : index
    %c0_15 = arith.constant 0 : index
    %14 = vector.load %arg12[%c16, %c0_15] : memref<36x648xbf16, #tpu.memory_space<vmem>>, vector<4x648xbf16>
    tpu.vector_store %arg12[%c16, %c0_15], %13 {strides = array<i32>} : memref<36x648xbf16, #tpu.memory_space<vmem>>, vector<4x648xbf16>,
    %c0_16 = arith.constant 0 : index
    %c129 = arith.constant 129 : index
    %15 = vector.load %arg0[%c0_16, %c129] : memref<4x904xbf16, #tpu.memory_space<vmem>>, vector<4x648xbf16>
    %c20 = arith.constant 20 : index
    %c0_17 = arith.constant 0 : index
    %16 = vector.load %arg12[%c20, %c0_17] : memref<36x648xbf16, #tpu.memory_space<vmem>>, vector<4x648xbf16>
    tpu.vector_store %arg12[%c20, %c0_17], %15 {strides = array<i32>} : memref<36x648xbf16, #tpu.memory_space<vmem>>, vector<4x648xbf16>,
    %c0_18 = arith.constant 0 : index
    %c145 = arith.constant 145 : index
    %17 = vector.load %arg0[%c0_18, %c145] : memref<4x904xbf16, #tpu.memory_space<vmem>>, vector<4x648xbf16>
    %c24 = arith.constant 24 : index
    %c0_19 = arith.constant 0 : index
    %18 = vector.load %arg12[%c24, %c0_19] : memref<36x648xbf16, #tpu.memory_space<vmem>>, vector<4x648xbf16>
    tpu.vector_store %arg12[%c24, %c0_19], %17 {strides = array<i32>} : memref<36x648xbf16, #tpu.memory_space<vmem>>, vector<4x648xbf16>,
    %c0_20 = arith.constant 0 : index
    %c146 = arith.constant 146 : index
    %19 = vector.load %arg0[%c0_20, %c146] : memref<4x904xbf16, #tpu.memory_space<vmem>>, vector<4x648xbf16>
    %c28 = arith.constant 28 : index
    %c0_21 = arith.constant 0 : index
    %20 = vector.load %arg12[%c28, %c0_21] : memref<36x648xbf16, #tpu.memory_space<vmem>>, vector<4x648xbf16>
    tpu.vector_store %arg12[%c28, %c0_21], %19 {strides = array<i32>} : memref<36x648xbf16, #tpu.memory_space<vmem>>, vector<4x648xbf16>,
    %c0_22 = arith.constant 0 : index
    %c147 = arith.constant 147 : index
    %21 = vector.load %arg0[%c0_22, %c147] : memref<4x904xbf16, #tpu.memory_space<vmem>>, vector<4x648xbf16>
    %c32 = arith.constant 32 : index
    %c0_23 = arith.constant 0 : index
    %22 = vector.load %arg12[%c32, %c0_23] : memref<36x648xbf16, #tpu.memory_space<vmem>>, vector<4x648xbf16>
    tpu.vector_store %arg12[%c32, %c0_23], %21 {strides = array<i32>} : memref<36x648xbf16, #tpu.memory_space<vmem>>, vector<4x648xbf16>,
    %c0_24 = arith.constant 0 : index
    %c0_25 = arith.constant 0 : index
    %23 = vector.load %arg2[%c0_24, %c0_25] : memref<8x36xbf16, #tpu.memory_space<vmem>>, vector<8x36xbf16>
    %c0_26 = arith.constant 0 : index
    %c0_27 = arith.constant 0 : index
    %24 = vector.load %arg12[%c0_26, %c0_27] : memref<36x648xbf16, #tpu.memory_space<vmem>>, vector<36x648xbf16>
    %cst_28 = arith.constant dense<0.000000e+00> : vector<8x648xf32>
    %25 = tpu.matmul %23, %24, %cst_28 {dimension_numbers = #tpu.dot_dimension_numbers<[1], [0], [0], [1], [0, 0, 1, 1], [], []>} : vector<8x36xbf16>, vector<36x648xbf16>, vector<8x648xf32> -> vector<8x648xf32>
    %26 = vector.extract_strided_slice %25 {offsets = [4, 0], sizes = [4, 648], strides = [1, 1]} : vector<8x648xf32> to vector<4x648xf32>
    %c0_29 = arith.constant 0 : index
    %c0_30 = arith.constant 0 : index
    %27 = vector.load %arg5[%c0_29, %c0_30] : memref<4x1xf32, #tpu.memory_space<vmem>>, vector<4x1xf32>
    %28 = vector.broadcast %27 : vector<4x1xf32> to vector<4x648xf32>
    %29 = arith.addf %26, %28 : vector<4x648xf32>
    %30 = vector.extract_strided_slice %25 {offsets = [0, 0], sizes = [4, 648], strides = [1, 1]} : vector<8x648xf32> to vector<4x648xf32>
    %c0_31 = arith.constant 0 : index
    %c0_32 = arith.constant 0 : index
    %31 = vector.load %arg3[%c0_31, %c0_32] : memref<4x1xf32, #tpu.memory_space<vmem>>, vector<4x1xf32>
    %c0_33 = arith.constant 0 : index
    %c0_34 = arith.constant 0 : index
    %32 = vector.load %arg4[%c0_33, %c0_34] : memref<4x1xf32, #tpu.memory_space<vmem>>, vector<4x1xf32>
    %33 = vector.broadcast %0 : vector<1x648xf32> to vector<4x648xf32>
    %34 = arith.mulf %30, %33 : vector<4x648xf32>
    %cst_35 = arith.constant dense<0.000000e+00> : vector<4xf32>
    %35 = vector.multi_reduction <add>, %34, %cst_35 [1] : vector<4x648xf32> to vector<4xf32>
    %36 = vector.shape_cast %35 : vector<4xf32> to vector<4x1xf32>
    %cst_36 = arith.constant 0.001953125 : f32
    %37 = vector.broadcast %cst_36 : f32 to vector<4x1xf32>
    %38 = arith.mulf %36, %37 : vector<4x1xf32>
    %39 = vector.broadcast %38 : vector<4x1xf32> to vector<4x648xf32>
    %40 = arith.subf %30, %39 : vector<4x648xf32>
    %41 = vector.broadcast %0 : vector<1x648xf32> to vector<4x648xf32>
    %42 = arith.mulf %40, %41 : vector<4x648xf32>
    %43 = arith.mulf %42, %42 : vector<4x648xf32>
    %cst_37 = arith.constant dense<0.000000e+00> : vector<4xf32>
    %44 = vector.multi_reduction <add>, %43, %cst_37 [1] : vector<4x648xf32> to vector<4xf32>
    %45 = vector.shape_cast %44 : vector<4xf32> to vector<4x1xf32>
    %cst_38 = arith.constant 0.001953125 : f32
    %46 = vector.broadcast %cst_38 : f32 to vector<4x1xf32>
    %47 = arith.mulf %45, %46 : vector<4x1xf32>
    %48 = vector.broadcast %38 : vector<4x1xf32> to vector<4x648xf32>
    %49 = arith.subf %30, %48 : vector<4x648xf32>
    %cst_39 = arith.constant 9.99999974E-6 : f32
    %50 = vector.broadcast %cst_39 : f32 to vector<4x1xf32>
    %51 = arith.addf %47, %50 : vector<4x1xf32>
    %52 = math.rsqrt %51 : vector<4x1xf32>
    %53 = vector.broadcast %52 : vector<4x1xf32> to vector<4x648xf32>
    %54 = arith.mulf %49, %53 : vector<4x648xf32>
    %55 = vector.broadcast %31 : vector<4x1xf32> to vector<4x648xf32>
    %56 = arith.mulf %54, %55 : vector<4x648xf32>
    %57 = vector.broadcast %32 : vector<4x1xf32> to vector<4x648xf32>
    %58 = arith.addf %56, %57 : vector<4x648xf32>
    %cst_40 = arith.constant 0.000000e+00 : f32
    %59 = vector.broadcast %cst_40 : f32 to vector<4x648xf32>
    %60 = arith.maximumf %58, %59 : vector<4x648xf32>
    %61 = vector.broadcast %0 : vector<1x648xf32> to vector<4x648xf32>
    %62 = arith.mulf %60, %61 : vector<4x648xf32>
    %63 = arith.truncf %62 : vector<4x648xf32> to vector<4x648xbf16>
    %c0_41 = arith.constant 0 : index
    %c128_42 = arith.constant 128 : index
    %64 = vector.load %arg13[%c0_41, %c128_42] : memref<4x904xbf16, #tpu.memory_space<vmem>>, vector<4x648xbf16>
    tpu.vector_store %arg13[%c0_41, %c128_42], %63 {strides = array<i32>} : memref<4x904xbf16, #tpu.memory_space<vmem>>, vector<4x648xbf16>,
    %c0_43 = arith.constant 0 : index
    %c109_44 = arith.constant 109 : index
    %65 = vector.load %arg13[%c0_43, %c109_44] : memref<4x904xbf16, #tpu.memory_space<vmem>>, vector<4x648xbf16>
    %c0_45 = arith.constant 0 : index
    %c0_46 = arith.constant 0 : index
    %66 = vector.load %arg12[%c0_45, %c0_46] : memref<36x648xbf16, #tpu.memory_space<vmem>>, vector<4x648xbf16>
    tpu.vector_store %arg12[%c0_45, %c0_46], %65 {strides = array<i32>} : memref<36x648xbf16, #tpu.memory_space<vmem>>, vector<4x648xbf16>,
    %c0_47 = arith.constant 0 : index
    %c110_48 = arith.constant 110 : index
    %67 = vector.load %arg13[%c0_47, %c110_48] : memref<4x904xbf16, #tpu.memory_space<vmem>>, vector<4x648xbf16>
    %c4_49 = arith.constant 4 : index
    %c0_50 = arith.constant 0 : index
    %68 = vector.load %arg12[%c4_49, %c0_50] : memref<36x648xbf16, #tpu.memory_space<vmem>>, vector<4x648xbf16>
    tpu.vector_store %arg12[%c4_49, %c0_50], %67 {strides = array<i32>} : memref<36x648xbf16, #tpu.memory_space<vmem>>, vector<4x648xbf16>,
    %c0_51 = arith.constant 0 : index
    %c111_52 = arith.constant 111 : index
    %69 = vector.load %arg13[%c0_51, %c111_52] : memref<4x904xbf16, #tpu.memory_space<vmem>>, vector<4x648xbf16>
    %c8_53 = arith.constant 8 : index
    %c0_54 = arith.constant 0 : index
    %70 = vector.load %arg12[%c8_53, %c0_54] : memref<36x648xbf16, #tpu.memory_space<vmem>>, vector<4x648xbf16>
    tpu.vector_store %arg12[%c8_53, %c0_54], %69 {strides = array<i32>} : memref<36x648xbf16, #tpu.memory_space<vmem>>, vector<4x648xbf16>,
    %c0_55 = arith.constant 0 : index
    %c127_56 = arith.constant 127 : index
    %71 = vector.load %arg13[%c0_55, %c127_56] : memref<4x904xbf16, #tpu.memory_space<vmem>>, vector<4x648xbf16>
    %c12_57 = arith.constant 12 : index
    %c0_58 = arith.constant 0 : index
    %72 = vector.load %arg12[%c12_57, %c0_58] : memref<36x648xbf16, #tpu.memory_space<vmem>>, vector<4x648xbf16>
    tpu.vector_store %arg12[%c12_57, %c0_58], %71 {strides = array<i32>} : memref<36x648xbf16, #tpu.memory_space<vmem>>, vector<4x648xbf16>,
    %c0_59 = arith.constant 0 : index
    %c128_60 = arith.constant 128 : index
    %73 = vector.load %arg13[%c0_59, %c128_60] : memref<4x904xbf16, #tpu.memory_space<vmem>>, vector<4x648xbf16>
    %c16_61 = arith.constant 16 : index
    %c0_62 = arith.constant 0 : index
    %74 = vector.load %arg12[%c16_61, %c0_62] : memref<36x648xbf16, #tpu.memory_space<vmem>>, vector<4x648xbf16>
    tpu.vector_store %arg12[%c16_61, %c0_62], %73 {strides = array<i32>} : memref<36x648xbf16, #tpu.memory_space<vmem>>, vector<4x648xbf16>,
    %c0_63 = arith.constant 0 : index
    %c129_64 = arith.constant 129 : index
    %75 = vector.load %arg13[%c0_63, %c129_64] : memref<4x904xbf16, #tpu.memory_space<vmem>>, vector<4x648xbf16>
    %c20_65 = arith.constant 20 : index
    %c0_66 = arith.constant 0 : index
    %76 = vector.load %arg12[%c20_65, %c0_66] : memref<36x648xbf16, #tpu.memory_space<vmem>>, vector<4x648xbf16>
    tpu.vector_store %arg12[%c20_65, %c0_66], %75 {strides = array<i32>} : memref<36x648xbf16, #tpu.memory_space<vmem>>, vector<4x648xbf16>,
    %c0_67 = arith.constant 0 : index
    %c145_68 = arith.constant 145 : index
    %77 = vector.load %arg13[%c0_67, %c145_68] : memref<4x904xbf16, #tpu.memory_space<vmem>>, vector<4x648xbf16>
    %c24_69 = arith.constant 24 : index
    %c0_70 = arith.constant 0 : index
    %78 = vector.load %arg12[%c24_69, %c0_70] : memref<36x648xbf16, #tpu.memory_space<vmem>>, vector<4x648xbf16>
    tpu.vector_store %arg12[%c24_69, %c0_70], %77 {strides = array<i32>} : memref<36x648xbf16, #tpu.memory_space<vmem>>, vector<4x648xbf16>,
    %c0_71 = arith.constant 0 : index
    %c146_72 = arith.constant 146 : index
    %79 = vector.load %arg13[%c0_71, %c146_72] : memref<4x904xbf16, #tpu.memory_space<vmem>>, vector<4x648xbf16>
    %c28_73 = arith.constant 28 : index
    %c0_74 = arith.constant 0 : index
    %80 = vector.load %arg12[%c28_73, %c0_74] : memref<36x648xbf16, #tpu.memory_space<vmem>>, vector<4x648xbf16>
    tpu.vector_store %arg12[%c28_73, %c0_74], %79 {strides = array<i32>} : memref<36x648xbf16, #tpu.memory_space<vmem>>, vector<4x648xbf16>,
    %c0_75 = arith.constant 0 : index
    %c147_76 = arith.constant 147 : index
    %81 = vector.load %arg13[%c0_75, %c147_76] : memref<4x904xbf16, #tpu.memory_space<vmem>>, vector<4x648xbf16>
    %c32_77 = arith.constant 32 : index
    %c0_78 = arith.constant 0 : index
    %82 = vector.load %arg12[%c32_77, %c0_78] : memref<36x648xbf16, #tpu.memory_space<vmem>>, vector<4x648xbf16>
    tpu.vector_store %arg12[%c32_77, %c0_78], %81 {strides = array<i32>} : memref<36x648xbf16, #tpu.memory_space<vmem>>, vector<4x648xbf16>,
    %c0_79 = arith.constant 0 : index
    %c0_80 = arith.constant 0 : index
    %83 = vector.load %arg6[%c0_79, %c0_80] : memref<4x36xbf16, #tpu.memory_space<vmem>>, vector<4x36xbf16>
    %c0_81 = arith.constant 0 : index
    %c0_82 = arith.constant 0 : index
    %84 = vector.load %arg12[%c0_81, %c0_82] : memref<36x648xbf16, #tpu.memory_space<vmem>>, vector<36x648xbf16>
    %cst_83 = arith.constant dense<0.000000e+00> : vector<4x648xf32>
    %85 = tpu.matmul %83, %84, %cst_83 {dimension_numbers = #tpu.dot_dimension_numbers<[1], [0], [0], [1], [0, 0, 1, 1], [], []>} : vector<4x36xbf16>, vector<36x648xbf16>, vector<4x648xf32> -> vector<4x648xf32>
    %c0_84 = arith.constant 0 : index
    %c0_85 = arith.constant 0 : index
    %86 = vector.load %arg7[%c0_84, %c0_85] : memref<4x1xf32, #tpu.memory_space<vmem>>, vector<4x1xf32>
    %c0_86 = arith.constant 0 : index
    %c0_87 = arith.constant 0 : index
    %87 = vector.load %arg8[%c0_86, %c0_87] : memref<4x1xf32, #tpu.memory_space<vmem>>, vector<4x1xf32>
    %88 = vector.broadcast %0 : vector<1x648xf32> to vector<4x648xf32>
    %89 = arith.mulf %85, %88 : vector<4x648xf32>
    %cst_88 = arith.constant dense<0.000000e+00> : vector<4xf32>
    %90 = vector.multi_reduction <add>, %89, %cst_88 [1] : vector<4x648xf32> to vector<4xf32>
    %91 = vector.shape_cast %90 : vector<4xf32> to vector<4x1xf32>
    %cst_89 = arith.constant 0.001953125 : f32
    %92 = vector.broadcast %cst_89 : f32 to vector<4x1xf32>
    %93 = arith.mulf %91, %92 : vector<4x1xf32>
    %94 = vector.broadcast %93 : vector<4x1xf32> to vector<4x648xf32>
    %95 = arith.subf %85, %94 : vector<4x648xf32>
    %96 = vector.broadcast %0 : vector<1x648xf32> to vector<4x648xf32>
    %97 = arith.mulf %95, %96 : vector<4x648xf32>
    %98 = arith.mulf %97, %97 : vector<4x648xf32>
    %cst_90 = arith.constant dense<0.000000e+00> : vector<4xf32>
    %99 = vector.multi_reduction <add>, %98, %cst_90 [1] : vector<4x648xf32> to vector<4xf32>
    %100 = vector.shape_cast %99 : vector<4xf32> to vector<4x1xf32>
    %cst_91 = arith.constant 0.001953125 : f32
    %101 = vector.broadcast %cst_91 : f32 to vector<4x1xf32>
    %102 = arith.mulf %100, %101 : vector<4x1xf32>
    %103 = vector.broadcast %93 : vector<4x1xf32> to vector<4x648xf32>
    %104 = arith.subf %85, %103 : vector<4x648xf32>
    %cst_92 = arith.constant 9.99999974E-6 : f32
    %105 = vector.broadcast %cst_92 : f32 to vector<4x1xf32>
    %106 = arith.addf %102, %105 : vector<4x1xf32>
    %107 = math.rsqrt %106 : vector<4x1xf32>
    %108 = vector.broadcast %107 : vector<4x1xf32> to vector<4x648xf32>
    %109 = arith.mulf %104, %108 : vector<4x648xf32>
    %110 = vector.broadcast %86 : vector<4x1xf32> to vector<4x648xf32>
    %111 = arith.mulf %109, %110 : vector<4x648xf32>
    %112 = vector.broadcast %87 : vector<4x1xf32> to vector<4x648xf32>
    %113 = arith.addf %111, %112 : vector<4x648xf32>
    %114 = arith.addf %113, %29 : vector<4x648xf32>
    %cst_93 = arith.constant 0.000000e+00 : f32
    %115 = vector.broadcast %cst_93 : f32 to vector<4x648xf32>
    %116 = arith.maximumf %114, %115 : vector<4x648xf32>
    %117 = vector.broadcast %0 : vector<1x648xf32> to vector<4x648xf32>
    %118 = arith.mulf %116, %117 : vector<4x648xf32>
    %119 = arith.truncf %118 : vector<4x648xf32> to vector<4x648xbf16>
    %c0_94 = arith.constant 0 : index
    %c128_95 = arith.constant 128 : index
    %120 = vector.load %arg13[%c0_94, %c128_95] : memref<4x904xbf16, #tpu.memory_space<vmem>>, vector<4x648xbf16>
    tpu.vector_store %arg13[%c0_94, %c128_95], %119 {strides = array<i32>} : memref<4x904xbf16, #tpu.memory_space<vmem>>, vector<4x648xbf16>,
    %c0_96 = arith.constant 0 : index
    %c128_97 = arith.constant 128 : index
    %121 = vector.load %arg13[%c0_96, %c128_97] : memref<4x904xbf16, #tpu.memory_space<vmem>>, vector<4x648xbf16>
    %c0_98 = arith.constant 0 : index
    %c0_99 = arith.constant 0 : index
    %122 = vector.load %arg12[%c0_98, %c0_99] : memref<36x648xbf16, #tpu.memory_space<vmem>>, vector<4x648xbf16>
    tpu.vector_store %arg12[%c0_98, %c0_99], %121 {strides = array<i32>} : memref<36x648xbf16, #tpu.memory_space<vmem>>, vector<4x648xbf16>,
    %c0_100 = arith.constant 0 : index
    %c129_101 = arith.constant 129 : index
    %123 = vector.load %arg13[%c0_100, %c129_101] : memref<4x904xbf16, #tpu.memory_space<vmem>>, vector<4x648xbf16>
    %c4_102 = arith.constant 4 : index
    %c0_103 = arith.constant 0 : index
    %124 = vector.load %arg12[%c4_102, %c0_103] : memref<36x648xbf16, #tpu.memory_space<vmem>>, vector<4x648xbf16>
    tpu.vector_store %arg12[%c4_102, %c0_103], %123 {strides = array<i32>} : memref<36x648xbf16, #tpu.memory_space<vmem>>, vector<4x648xbf16>,
    %c0_104 = arith.constant 0 : index
    %c146_105 = arith.constant 146 : index
    %125 = vector.load %arg13[%c0_104, %c146_105] : memref<4x904xbf16, #tpu.memory_space<vmem>>, vector<4x648xbf16>
    %c8_106 = arith.constant 8 : index
    %c0_107 = arith.constant 0 : index
    %126 = vector.load %arg12[%c8_106, %c0_107] : memref<36x648xbf16, #tpu.memory_space<vmem>>, vector<4x648xbf16>
    tpu.vector_store %arg12[%c8_106, %c0_107], %125 {strides = array<i32>} : memref<36x648xbf16, #tpu.memory_space<vmem>>, vector<4x648xbf16>,
    %c0_108 = arith.constant 0 : index
    %c147_109 = arith.constant 147 : index
    %127 = vector.load %arg13[%c0_108, %c147_109] : memref<4x904xbf16, #tpu.memory_space<vmem>>, vector<4x648xbf16>
    %c12_110 = arith.constant 12 : index
    %c0_111 = arith.constant 0 : index
    %128 = vector.load %arg12[%c12_110, %c0_111] : memref<36x648xbf16, #tpu.memory_space<vmem>>, vector<4x648xbf16>
    tpu.vector_store %arg12[%c12_110, %c0_111], %127 {strides = array<i32>} : memref<36x648xbf16, #tpu.memory_space<vmem>>, vector<4x648xbf16>,
    %c0_112 = arith.constant 0 : index
    %c0_113 = arith.constant 0 : index
    %129 = vector.load %arg9[%c0_112, %c0_113] : memref<32x16xbf16, #tpu.memory_space<vmem>>, vector<32x16xbf16>
    %c0_114 = arith.constant 0 : index
    %c0_115 = arith.constant 0 : index
    %130 = vector.load %arg12[%c0_114, %c0_115] : memref<36x648xbf16, #tpu.memory_space<vmem>>, vector<16x648xbf16>
    %cst_116 = arith.constant dense<0.000000e+00> : vector<32x648xf32>
    %131 = tpu.matmul %129, %130, %cst_116 {dimension_numbers = #tpu.dot_dimension_numbers<[1], [0], [0], [1], [0, 0, 1, 1], [], []>} : vector<32x16xbf16>, vector<16x648xbf16>, vector<32x648xf32> -> vector<32x648xf32>
    %c0_117 = arith.constant 0 : index
    %c0_118 = arith.constant 0 : index
    %132 = vector.load %arg10[%c0_117, %c0_118] : memref<32x1xf32, #tpu.memory_space<vmem>>, vector<32x1xf32>
    %133 = vector.broadcast %132 : vector<32x1xf32> to vector<32x648xf32>
    %134 = arith.addf %131, %133 : vector<32x648xf32>
    %c0_119 = arith.constant 0 : index
    %c0_120 = arith.constant 0 : index
    %135 = vector.load %arg11[%c0_119, %c0_120] : memref<32x648xf32, #tpu.memory_space<vmem>>, vector<32x648xf32>
    tpu.vector_store %arg11[%c0_119, %c0_120], %134 {strides = array<i32>} : memref<32x648xf32, #tpu.memory_space<vmem>>, vector<32x648xf32>,
    return
  }
}

</mosaic_0001>

<bundles_post_ra>
// kernel: tpu_custom_call.1
= control target key start
LH: loop header
LB: loop body
LE: loop exit
PB: predicated region body
PF: predicated region fallthrough
CT: control target
= control target key end

     0   :  { %v54_v0 = vlaneseq  ;;  %v2366_v3 = vmov 1983009808   ;;  %s3035_s0 = inlined_call_operand.vmem [shape: bf16[4,904], index: 0, kind: input, shape index: {}]   ;;  %s3036_s1 = inlined_call_operand.vmem [shape: f32[1,648], index: 1, kind: input, shape index: {}]   ;;  %s3037_s2 = inlined_call_operand.vmem [shape: bf16[8,36], index: 2, kind: input, shape index: {}]   ;;  %s3038_s3 = inlined_call_operand.vmem [shape: f32[4,1], index: 3, kind: input, shape index: {}]   ;;  %s3039_s4 = inlined_call_operand.vmem [shape: f32[4,1], index: 4, kind: input, shape index: {}]   ;;  %s3040_s5 = inlined_call_operand.vmem [shape: f32[4,1], index: 5, kind: input, shape index: {}]   ;;  %s3041_s6 = inlined_call_operand.vmem [shape: bf16[4,36], index: 6, kind: input, shape index: {}]   ;;  %s3042_s7 = inlined_call_operand.vmem [shape: f32[4,1], index: 7, kind: input, shape index: {}]   ;;  %s3043_s8 = inlined_call_operand.vmem [shape: f32[4,1], index: 8, kind: input, shape index: {}]   ;;  %s3044_s9 = inlined_call_operand.vmem [shape: bf16[32,16], index: 9, kind: input, shape index: {}]   ;;  %s3045_s10 = inlined_call_operand.vmem [shape: f32[32,1], index: 10, kind: input, shape index: {}]   ;;  %s3046_s11 = inlined_call_operand.hbm [shape: f32[32,648], index: 11, kind: output, shape index: {}]  }
   0x1   :  { %v97_v1 = vld [vmem:[%s3035_s0] sm:$0xff]  ;;  %v52_v4 = vunpack.c.l.s4 %v2366_v3 }
   0x2   :  { %v286_v2 = vld [vmem:[%s3035_s0 + $0x2] sm:$0xff]  ;;  %v2445_v5 = vshrl.u32 %v54_v0, 7  ;;  %v101_v8 = vcombine.low %v97_v1, %v97_v1  ;;  %v50_v10 = vcombine.high %v97_v1, %v97_v1 }
   0x3   :  { %2163 = vst.sshfl [vmem:[#allocation2 + $0x30] sm:$0xf pattern:$0x76325410] %v286_v2  ;;  %v338_v6 = vcombine.high %v286_v2, %v286_v2  ;;  %v53_v7 = vunpack.c.0.s8 %v52_v4 }
   0x5   :  { %2164 = vst.sshfl [vmem:[#allocation2 + $0x38] sm:$0xf pattern:$0x76325410] %v338_v6  ;;  %v2448_v9 = vsub.s32 %v53_v7, %v2445_v5 }
   0x7   :  { %v108_v11 = vrot.slane %v101_v8, %v2448_v9  ;;  %v57_v12 = vrot.slane %v97_v1, %v2448_v9 }
   0x8   :  { %16 = vsyncpa [#allocation5], 0  ;;  %s2367_s21 = smov 18   ;;  %s2368_s22 = smov 19   ;;  %v64_v13 = vrot.slane %v50_v10, %v2448_v9  ;;  %v290_v14 = vcombine.low %v286_v2, %v286_v2  ;;  %v304_v15 = vrot.slane %v286_v2, %v2448_v9  ;;  %v352_v17 = vrot.slane %v338_v6, %v2448_v9  ;;  %v2267_v20 = vld [vmem:[%s3035_s0 + $0x8] ss:$0 sps:$4 sm:$0xff]  }
   0x9   :  { %124 = vrot.lane.b32.xlu1 %v108_v11, %s2367_s21  ;;  %72 = vrot.lane.b32.xlu0 %v57_v12, %s2368_s22  ;;  %s2369_s23 = smov 17   ;;  %s2370_s24 = smov 1   ;;  %vm93_vm0 = vcmask 1041408   ;;  %vm94_vm1 = vcmask 62468   ;;  %v196_v21 = vld [vmem:[%s3035_s0 + $0x8] sm:$0x3f]  ;;  %v123_v22 = vrot.slane %v2267_v20, %v2448_v9 }
   0xa   :  { %v297_v16 = vrot.slane %v290_v14, %v2448_v9  ;;  %s2371_s25 = smov 127   ;;  %v2165_v18 = vld.sshfl [vmem:[%s3035_s0 + $0xa] sm:$0x33 pattern:$0x76325410]  ;;  %vm2470_vm2 = vmor %vm94_vm1, %vm93_vm0  ;;  %s2372_s28 = smov 111   ;;  %v214_v23 = vcombine.low %v196_v21, %v196_v21  ;;  %v228_v28 = vrot.slane %v196_v21, %v2448_v9 }
   0xb   :  { %285 = vst.msk [vmem:[#allocation2 + $0x40] sm:$0x33] %vm2470_vm2, %v2165_v18  ;;  %s2373_s14 = smov 110   ;;  %v2269_v26 = vld [vmem:[%s3035_s0 + $0xa] ss:$0 sps:$4 sm:$0xff]   ;;  %s2374_s19 = smov 109  }
   0xc   :  { %v2160_v24 = vld.sshfl [vmem:[%s3035_s0 + $0x8] sm:$0x33 pattern:$0x76325410]  ;;  %v221_v25 = vrot.slane %v214_v23, %v2448_v9  ;;  %v312_v27 = vrot.slane %v2269_v26, %v2448_v9  ;;  %v2375_v31 = vmov 0   ;;  %vm81_vm3 = vcmask 1043456  }
   0xd   :  { %126 = vrot.lane.b32.xlu1 %v57_v12, %s2367_s21  ;;  %74 = vrot.lane.b32.xlu0 %v64_v13, %s2368_s22  ;;  %v2270_v29 = vld [vmem:[%s3035_s0 + $0xa] ss:$0 sps:$4 sm:$0xff]   ;;  %41 = vst [vmem:[#allocation3] sm:$0x3] %v2375_v31  ;;  %vm134_vm4 = vcmask 146432   ;;  %vm83_vm5 = vcmask 154624  }
   0xe   :  { %v407_v30 = vrot.slane %v2270_v29, %v2448_v9  ;;  %621 = vmatprep.mubr.bf16.mxu0 %v2375_v31  ;;  %662 = vmatprep.mubr.bf16.mxu1 %v2375_v31  ;;  %vm184_vm6 = vcmask 138240   ;;  %vm242_vm7 = vcmask 7168   ;;  %vm323_vm8 = vcmask 1039360  }
   0xf   :  { %2261 = vset.pattern.permute.xlu0 %v2375_v31  ;;  %2262 = vset.pattern.permute.xlu1 %v2375_v31  ;;  %vm370_vm9 = vcmask 908288   ;;  %vm418_vm10 = vcmask 900096   ;;  %vm144_vm11 = vcmask 1043458   ;;  %vm145_vm12 = vcmask 64518  }
  0x10   :  { %vm2561_vm13 = vmor %vm145_vm12, %vm144_vm11  ;;  %vm465_vm14 = vcmask 891904   ;;  %vm3047_vm15 = vcmask 293888   ;;  %vm774_vm1 = vcmask 60416   ;;  %vm42_vm11 = vcmask 1041472  }
  0x11   :  { %176 = vrot.lane.b32.xlu1 %v64_v13, %s2369_s23  ;;  %174 = vrot.lane.b32.xlu0 %v57_v12, %s2369_s23  ;;  %vm43_vm12 = vcmask 60418  }
  0x15   :  { %231 = vrot.lane.b32.xlu1 %v57_v12, %s2370_s24  ;;  %229 = vrot.lane.b32.xlu0 %v108_v11, %s2370_s24 }
  0x19   :  { %315 = vrot.lane.b32.xlu1 %v304_v15, %s2371_s25  ;;  %313 = vrot.lane.b32.xlu0 %v297_v16, %s2371_s25 }
  0x1d   :  { %362 = vrot.lane.b32.xlu1 %v352_v17, %s2372_s28  ;;  %360 = vrot.lane.b32.xlu0 %v304_v15, %s2372_s28 }
  0x21   :  { %410 = vrot.lane.b32.xlu1 %v304_v15, %s2373_s14  ;;  %408 = vrot.lane.b32.xlu0 %v297_v16, %s2373_s14 }
  0x25   :  { %128 = vrot.lane.b32.xlu1 %v123_v22, %s2367_s21  ;;  %76 = vrot.lane.b32.xlu0 %v2160_v24, %s2368_s22 }
  0x29   :  { %233 = vrot.lane.b32.xlu1 %v221_v25, %s2370_s24  ;;  %178 = vrot.lane.b32.xlu0 %v2160_v24, %s2369_s23 }
  0x2d   :  { %457 = vrot.lane.b32.xlu1 %v352_v17, %s2374_s19  ;;  %455 = vrot.lane.b32.xlu0 %v304_v15, %s2374_s19 }
  0x31   :  { %317 = vrot.lane.b32.xlu1 %v312_v27, %s2371_s25  ;;  %235 = vrot.lane.b32.xlu0 %v228_v28, %s2370_s24 }
  0x35   :  { %412 = vrot.lane.b32.xlu1 %v407_v30, %s2373_s14  ;;  %364 = vrot.lane.b32.xlu0 %v2165_v18, %s2372_s28 }
  0x39   :  { %459 = vrot.lane.b32.xlu0 %v2165_v18, %s2374_s19 }
  0x7b   :  { %v125_v32 = vpop.permute.xlu1 %124  ;;  %v73_v33 = vpop.permute.xlu0 %72 }
  0x7c   :  { %v130_v36 = vrot.slane %v125_v32, 4  ;;  %v78_v37 = vrot.slane %v73_v33, 4 }
  0x7f   :  { %v2516_v34 = vpop.permute.xlu1 %126  ;;  %v2518_v35 = vpop.permute.xlu0 %74 }
  0x80   :  { %v131_v38 = vrot.slane %v2516_v34, 4  ;;  %v79_v39 = vrot.slane %v2518_v35, 4 }
  0x82   :  { %v133_v40 = vsel %vm81_vm3, %v130_v36, %v131_v38  ;;  %v82_v41 = vsel %vm81_vm3, %v78_v37, %v79_v39 }
  0x83   :  { %v135_v42 = vsel %vm134_vm4, %v125_v32, %v133_v40  ;;  %v84_v43 = vsel %vm83_vm5, %v73_v33, %v82_v41  ;;  %v2528_v44 = vpop.permute.xlu1 %176  ;;  %v175_v45 = vpop.permute.xlu0 %174 }
  0x84   :  { %142 = vst [vmem:[#allocation2] sm:$0xcc] %v135_v42  ;;  %91 = vst [vmem:[#allocation2] sm:$0x33] %v84_v43  ;;  %v181_v46 = vrot.slane %v2528_v44, 4  ;;  %v180_v47 = vrot.slane %v175_v45, 4 }
  0x86   :  { %v183_v48 = vsel %vm81_vm3, %v180_v47, %v181_v46 }
  0x87   :  { %v185_v49 = vsel %vm184_vm6, %v175_v45, %v183_v48  ;;  %v2535_v50 = vpop.permute.xlu1 %231  ;;  %v230_v51 = vpop.permute.xlu0 %229 }
  0x88   :  { %192 = vst [vmem:[#allocation2 + $0x18] sm:$0x33] %v185_v49  ;;  %v238_v52 = vrot.slane %v2535_v50, 4  ;;  %v237_v53 = vrot.slane %v230_v51, 4 }
  0x8a   :  { %v241_v54 = vsel %vm81_vm3, %v237_v53, %v238_v52 }
  0x8b   :  { %v243_v55 = vsel %vm242_vm7, %v230_v51, %v241_v54  ;;  %v2540_v56 = vpop.permute.xlu1 %315  ;;  %v314_v57 = vpop.permute.xlu0 %313  ;;  %v477_v7 = vld [vmem:[#allocation2] sm:$0xff] }
  0x8c   :  { %251 = vst [vmem:[#allocation2 + $0x18] sm:$0xcc] %v243_v55  ;;  %v320_v58 = vrot.slane %v2540_v56, 4  ;;  %v319_v59 = vrot.slane %v314_v57, 4 }
  0x8e   :  { %v322_v60 = vsel %vm81_vm3, %v319_v59, %v320_v58 }
  0x8f   :  { %v324_v61 = vsel %vm323_vm8, %v314_v57, %v322_v60  ;;  %v2547_v62 = vpop.permute.xlu1 %362  ;;  %v361_v63 = vpop.permute.xlu0 %360 }
  0x90   :  { %331 = vst [vmem:[#allocation2 + $0x30] sm:$0xcc] %v324_v61  ;;  %v367_v0 = vrot.slane %v2547_v62, 4  ;;  %v366_v1 = vrot.slane %v361_v63, 4 }
  0x92   :  { %v369_v2 = vsel %vm81_vm3, %v366_v1, %v367_v0 }
  0x93   :  { %v371_v3 = vsel %vm370_vm9, %v361_v63, %v369_v2  ;;  %v2554_v4 = vpop.permute.xlu1 %410  ;;  %v409_v6 = vpop.permute.xlu0 %408  ;;  %v480_v8 = vld [vmem:[#allocation2 + $0x18] sm:$0xff] }
  0x94   :  { %v2271_v10 = vld [vmem:[#allocation2 + $0x4] ss:$24 sps:$4 sm:$0xff]   ;;  %378 = vst [vmem:[#allocation2 + $0x48] sm:$0x33] %v371_v3  ;;  %v415_v11 = vrot.slane %v2554_v4, 4  ;;  %v414_v12 = vrot.slane %v409_v6, 4  ;;  %v2167_v13 = vcombine.low %v477_v7, %v480_v8 }
  0x95   :  { %589 = vmatprep.subr.bf16.mxu0 %v2271_v10 }
  0x96   :  { %v417_v14 = vsel %vm81_vm3, %v414_v12, %v415_v11  ;;  %590 = vmatpush1.bf16.msra.mxu0 %v2167_v13 }
  0x97   :  { %v419_v15 = vsel %vm418_vm10, %v409_v6, %v417_v14  ;;  %v129_v16 = vpop.permute.xlu1 %128  ;;  %v77_v17 = vpop.permute.xlu0 %76  ;;  %v483_v40 = vld [vmem:[#allocation2 + $0x30] sm:$0xff] }
  0x98   :  { %426 = vst [vmem:[#allocation2 + $0x48] sm:$0xcc] %v419_v15  ;;  %v132_v20 = vrot.slane %v129_v16, 4  ;;  %v80_v21 = vrot.slane %v77_v17, 4 }
  0x9a   :  { %v136_v22 = vsel %vm81_vm3, %v131_v38, %v132_v20  ;;  %v138_v23 = vsel %vm134_vm4, %v129_v16, %v132_v20  ;;  %v85_v24 = vsel %vm81_vm3, %v79_v39, %v80_v21  ;;  %v87_v25 = vsel %vm83_vm5, %v77_v17, %v80_v21  ;;  %v476_v17 = vld [vmem:[%s3037_s2] sm:$0xf] }
  0x9b   :  { %v137_v26 = vsel %vm134_vm4, %v2516_v34, %v136_v22  ;;  %147 = vst.msk [vmem:[#allocation2 + $0x10] sm:$0xcc] %vm2561_vm13, %v138_v23  ;;  %v86_v27 = vsel %vm83_vm5, %v2518_v35, %v85_v24  ;;  %v234_v28 = vpop.permute.xlu1 %233  ;;  %v179_v29 = vpop.permute.xlu0 %178 }
  0x9c   :  { %96 = vst.msk [vmem:[#allocation2 + $0x10] sm:$0x33] %vm2470_vm2, %v87_v25  ;;  %143 = vst [vmem:[#allocation2 + $0x8] sm:$0xcc] %v137_v26  ;;  %v239_v30 = vrot.slane %v234_v28, 4  ;;  %v182_v32 = vrot.slane %v179_v29, 4 }
  0x9d   :  { %92 = vst [vmem:[#allocation2 + $0x8] sm:$0x33] %v86_v27 }
  0x9e   :  { %v244_v33 = vsel %vm81_vm3, %v238_v52, %v239_v30  ;;  %v186_v34 = vsel %vm81_vm3, %v181_v46, %v182_v32  ;;  %v188_v36 = vsel %vm184_vm6, %v179_v29, %v182_v32 }
  0x9f   :  { %v245_v35 = vsel %vm242_vm7, %v2535_v50, %v244_v33  ;;  %v187_v37 = vsel %vm184_vm6, %v2528_v44, %v186_v34  ;;  %194 = vst.msk [vmem:[#allocation2 + $0x28] sm:$0x33] %vm2470_vm2, %v188_v36  ;;  %v458_v38 = vpop.permute.xlu1 %457  ;;  %v456_v39 = vpop.permute.xlu0 %455  ;;  %v486_v41 = vld [vmem:[#allocation2 + $0x48] sm:$0xff] }
  0xa0   :  { %v2273_v42 = vld [vmem:[#allocation2 + $0x34] ss:$24 sps:$4 sm:$0xff]   ;;  %252 = vst [vmem:[#allocation2 + $0x20] sm:$0xcc] %v245_v35  ;;  %193 = vst [vmem:[#allocation2 + $0x20] sm:$0x33] %v187_v37  ;;  %v2173_v46 = vcombine.low %v483_v40, %v486_v41 }
  0xa1   :  { %v462_v43 = vrot.slane %v458_v38, 4  ;;  %v461_v45 = vrot.slane %v456_v39, 4  ;;  %591 = vmatprep.subr.bf16.mxu0 %v2273_v42  ;;  %v730_v35 = vsub.s32 0, %v2445_v5  ;;  %v40_v37 = vld [vmem:[%s3036_s1] sm:$0x3f] }
  0xa2   :  { %592 = vmatpush1.bf16.msra.mxu0 %v2173_v46 }
  0xa3   :  { %v464_v47 = vsel %vm81_vm3, %v461_v45, %v462_v43  ;;  %v318_v48 = vpop.permute.xlu1 %317  ;;  %v236_v49 = vpop.permute.xlu0 %235 }
  0xa4   :  { %v466_v44 = vsel %vm465_vm14, %v456_v39, %v464_v47  ;;  %v321_v50 = vrot.slane %v318_v48, 4  ;;  %v240_v51 = vrot.slane %v236_v49, 4  ;;  %v2645_v39 = vrot.slane %v40_v37, %v730_v35 }
  0xa5   :  { %473 = vst [vmem:[#allocation2 + $0x60] sm:$0x33] %v466_v44 }
  0xa6   :  { %v325_v52 = vsel %vm81_vm3, %v320_v58, %v321_v50  ;;  %v327_v53 = vsel %vm323_vm8, %v318_v48, %v321_v50  ;;  %v246_v54 = vsel %vm81_vm3, %v239_v30, %v240_v51  ;;  %v738_v50 = vsub.s32 2, %v2445_v5 }
  0xa7   :  { %v326_v55 = vsel %vm323_vm8, %v2540_v56, %v325_v52  ;;  %333 = vst.msk [vmem:[#allocation2 + $0x40] sm:$0xcc] %vm2561_vm13, %v327_v53  ;;  %v247_v57 = vsel %vm242_vm7, %v234_v28, %v246_v54  ;;  %v413_v59 = vpop.permute.xlu1 %412  ;;  %v365_v60 = vpop.permute.xlu0 %364  ;;  %v2275_v61 = vld [vmem:[#allocation2 + $0xc] ss:$24 sps:$4 sm:$0xff]   ;;  %v2277_v63 = vld [vmem:[#allocation2 + $0x8] ss:$24 sps:$4 sm:$0xff]  }
  0xa8   :  { %332 = vst [vmem:[#allocation2 + $0x38] sm:$0xcc] %v326_v55  ;;  %253 = vst.msk [vmem:[#allocation2 + $0x28] sm:$0xcc] %vm2561_vm13, %v247_v57  ;;  %v416_v58 = vrot.slane %v413_v59, 4  ;;  %v368_v1 = vrot.slane %v365_v60, 4  ;;  %630 = vmatprep.subr.bf16.mxu1 %v2275_v61  ;;  %v2662_v53 = vrot.slane %v40_v37, %v738_v50 }
  0xa9   :  { %631 = vmatpush1.bf16.msra.mxu1 %v2277_v63  ;;  %v746_v51 = vsub.s32 4, %v2445_v5  ;;  %v742_v52 = vsub.s32 3, %v2445_v5  ;;  %v750_v55 = vsub.s32 5, %v2445_v5 }
  0xaa   :  { %v420_v56 = vsel %vm81_vm3, %v415_v11, %v416_v58  ;;  %v422_v2 = vsel %vm418_vm10, %v413_v59, %v416_v58  ;;  %v372_v3 = vsel %vm81_vm3, %v367_v0, %v368_v1  ;;  %v374_v6 = vsel %vm370_vm9, %v365_v60, %v368_v1 }
  0xab   :  { %v421_v7 = vsel %vm418_vm10, %v2554_v4, %v420_v56  ;;  %428 = vst.msk [vmem:[#allocation2 + $0x58] sm:$0xcc] %vm2561_vm13, %v422_v2  ;;  %v373_v8 = vsel %vm370_vm9, %v2547_v62, %v372_v3  ;;  %v460_v10 = vpop.permute.xlu0 %459  ;;  %v2664_v54 = vrot.slane %v40_v37, %v746_v51  ;;  %v2667_v57 = vrot.slane %v40_v37, %v742_v52 }
  0xac   :  { %380 = vst.msk [vmem:[#allocation2 + $0x58] sm:$0x33] %vm2470_vm2, %v374_v6  ;;  %v489_v11 = vld [vmem:[#allocation2 + $0x60] sm:$0x33]  ;;  %427 = vst [vmem:[#allocation2 + $0x50] sm:$0xcc] %v421_v7  ;;  %v2681_v56 = vrot.slane %v40_v37, %v750_v55 }
  0xad   :  { %379 = vst [vmem:[#allocation2 + $0x50] sm:$0x33] %v373_v8  ;;  %v463_v0 = vrot.slane %v460_v10, 4  ;;  %v2180_v12 = vcombine.high %v489_v11, %v489_v11  ;;  %v2179_v13 = vcombine.low %v489_v11, %v489_v11 }
  0xae   :  { %v485_v25 = vld [vmem:[#allocation2 + $0x40] sm:$0xff] }
  0xaf   :  { %v467_v14 = vsel %vm81_vm3, %v462_v43, %v463_v0  ;;  %v469_v4 = vsel %vm465_vm14, %v460_v10, %v463_v0  ;;  %2185 = vmatprep.subr.msk.bf16.mxu0 %vm93_vm0, %v2180_v12  ;;  %v572_v15 = vsel %vm93_vm0, %v2179_v13, 0  ;;  %v2280_v16 = vld [vmem:[#allocation2 + $0x14] ss:$24 sps:$4 sm:$0xff]   ;;  %v2282_v20 = vld [vmem:[#allocation2 + $0x10] ss:$24 sps:$4 sm:$0xff]  }
  0xb0   :  { %v468_v62 = vsel %vm465_vm14, %v458_v38, %v467_v14  ;;  %475 = vst.msk [vmem:[#allocation2 + $0x70] sm:$0x33] %vm2470_vm2, %v469_v4  ;;  %594 = vmatpush1.bf16.msra.mxu0 %v572_v15  ;;  %v734_v38 = vsub.s32 1, %v2445_v5 }
  0xb1   :  { %474 = vst [vmem:[#allocation2 + $0x68] sm:$0x33] %v468_v62  ;;  %671 = vmatprep.subr.bf16.mxu0 %v2280_v16  ;;  %v726_v62 = vld [vmem:[%s3039_s4] sm:$0xf] }
  0xb2   :  { %v2647_v40 = vrot.slane %v40_v37, %v734_v38 }
  0xb3   :  { %2186 = vmatmul.mubr.msk.bf16.vlgmr.msra.gmra.mrb[0].mxu0 %vm3047_vm15, %v476_v17  ;;  %v488_v21 = vld [vmem:[#allocation2 + $0x58] sm:$0xff] }
  0xb4   :  { %v2283_v22 = vld [vmem:[#allocation2 + $0x44] ss:$24 sps:$4 sm:$0xff]   ;;  %672 = vmatpush1.bf16.msra.mxu0 %v2282_v20  ;;  %v2287_v24 = vld [vmem:[#allocation2 + $0x38] ss:$24 sps:$4 sm:$0xff]   ;;  %703 = vmatprep.mubr.bf16.mxu0 %v2375_v31  ;;  %v2177_v26 = vcombine.low %v485_v25, %v488_v21 }
  0xb5   :  { %v2285_v23 = vld [vmem:[#allocation2 + $0x3c] ss:$24 sps:$4 sm:$0xff]   ;;  %673 = vmatprep.subr.bf16.mxu0 %v2283_v22 }
  0xb6   :  { %632 = vmatprep.subr.bf16.mxu1 %v2285_v23 }
  0xb7   :  { %633 = vmatpush1.bf16.msra.mxu1 %v2287_v24  ;;  %v491_v27 = vld [vmem:[#allocation2 + $0x70] sm:$0x33] }
  0xb8   :  { %674 = vmatpush1.bf16.msra.mxu0 %v2177_v26  ;;  %v2184_v28 = vcombine.high %v491_v27, %v491_v27  ;;  %v490_v29 = vld [vmem:[#allocation2 + $0x68] sm:$0x33]  ;;  %v2183_v30 = vcombine.low %v491_v27, %v491_v27 }
  0xb9   :  { %v2182_v32 = vcombine.high %v490_v29, %v490_v29  ;;  %v2181_v33 = vcombine.low %v490_v29, %v490_v29 }
  0xba   :  { %2189 = vmatprep.subr.msk.bf16.mxu0 %vm93_vm0, %v2184_v28  ;;  %v584_v34 = vsel %vm93_vm0, %v2183_v30, 0 }
  0xbb   :  { %2187 = vmatprep.subr.msk.bf16.mxu1 %vm93_vm0, %v2182_v32  ;;  %v578_v36 = vsel %vm93_vm0, %v2181_v33, 0 }
  0xbc   :  { %635 = vmatpush1.bf16.msra.mxu1 %v578_v36  ;;  %676 = vmatpush1.bf16.msra.mxu0 %v584_v34 }
  0xbf   :  { %2188 = vmatmul.mubr.msk.bf16.vlgmr.msra.gmra.mrb[0].mxu1 %vm3047_vm15, %v476_v17  ;;  %2190 = vmatmul.mubr.msk.bf16.vlgmr.msra.gmra.mrb[4].mxu0 %vm3047_vm15, %v476_v17  ;;  %vm44_vm15 = vmor %vm43_vm12, %vm42_vm11 }
  0xc0   :  { %1455 = vmatprep.mubr.bf16.mxu1 %v2375_v31  ;;  %1496 = vmatprep.mubr.bf16.mxu0 %v2375_v31  ;;  %45 = vst.msk [vmem:[#allocation3 + $0xc] sm:$0xf] %vm44_vm15, %v2375_v31  ;;  %vm2725_vm15 = vmor %vm43_vm12, %vm93_vm0 }
 0x186   :  { %v2649_v41 = vpop.f32.mrb[0].mxu0 }
 0x187   :  { %v758_v42 = vmul.f32 %v2645_v39, %v2649_v41  ;;  %v2653_v43 = vpop.f32.mrb[1].mxu0 }
 0x188   :  { %v759_v45 = vmul.f32 %v2647_v40, %v2653_v43  ;;  %v627_v46 = vpop.f32.mrb[2].mxu0 }
 0x189   :  { %v765_v47 = vsel %vm81_vm3, %v758_v42, 0.0  ;;  %v628_v44 = vpop.f32.mrb[3].mxu0 }
 0x18a   :  { %v766_v48 = vsel %vm81_vm3, %v759_v45, 0.0 }
 0x18b   :  { %v767_v49 = vadd.f32 %v766_v48, %v765_v47 }
 0x192   :  { %v2669_v59 = vpop.f32.mrb[0].mxu1  ;;  %v2671_v60 = vpop.f32.mrb[4].mxu0 }
 0x193   :  { %v760_v61 = vmul.f32 %v2662_v53, %v2669_v59  ;;  %v2675_v63 = vpop.f32.mrb[1].mxu1  ;;  %v762_v58 = vmul.f32 %v2664_v54, %v2671_v60  ;;  %v2679_v1 = vpop.f32.mrb[5].mxu0 }
 0x194   :  { %v761_v5 = vmul.f32 %v2667_v57, %v2675_v63  ;;  %v668_v2 = vpop.f32.mrb[2].mxu1  ;;  %v709_v3 = vpop.f32.mrb[6].mxu0  ;;  %v763_v0 = vmul.f32 %v2681_v56, %v2679_v1 }
 0x195   :  { %v768_v6 = vsel %vm81_vm3, %v760_v61, 0.0  ;;  %v669_v7 = vpop.f32.mrb[3].mxu1  ;;  %v710_v8 = vpop.f32.mrb[7].mxu0  ;;  %v772_v12 = vsel %vm81_vm3, %v762_v58, 0.0  ;;  %v725_v61 = vld [vmem:[%s3038_s3] sm:$0xf] }
 0x196   :  { %v769_v10 = vadd.f32 %v768_v6, %v767_v49  ;;  %v770_v11 = vsel %vm81_vm3, %v761_v5, 0.0  ;;  %v775_v4 = vsel %vm774_vm1, %v763_v0, 0.0 }
 0x198   :  { %v771_v13 = vadd.f32 %v770_v11, %v769_v10 }
 0x19a   :  { %v773_v14 = vadd.f32 %v772_v12, %v771_v13 }
 0x19c   :  { %v776_v15 = vadd.f32 %v775_v4, %v773_v14 }
 0x19e   :  { %777 = vadd.xlane.f32.xlu1 %v776_v15 }
 0x1af   :  { %833 = vperm.xlu1 %2262, %v726_v62  }
 0x22b   :  { %v778_v16 = vpop.xlane.xlu1 %777 }
 0x22c   :  { %v779_v17 = vmul.f32 0.001953125, %v778_v16 }
 0x22e   :  { %v780_v20 = vsub.f32 %v2649_v41, %v779_v17  ;;  %v781_v21 = vsub.f32 %v2653_v43, %v779_v17  ;;  %v782_v22 = vsub.f32 %v2669_v59, %v779_v17  ;;  %v783_v23 = vsub.f32 %v2675_v63, %v779_v17 }
 0x22f   :  { %v784_v24 = vsub.f32 %v2671_v60, %v779_v17  ;;  %v785_v25 = vsub.f32 %v2679_v1, %v779_v17  ;;  %v834_v13 = vpop.permute.xlu1 %833 }
 0x230   :  { %v786_v26 = vmul.f32 %v780_v20, %v2645_v39  ;;  %v787_v27 = vmul.f32 %v781_v21, %v2647_v40  ;;  %v788_v28 = vmul.f32 %v782_v22, %v2662_v53  ;;  %v789_v29 = vmul.f32 %v783_v23, %v2667_v57 }
 0x231   :  { %v790_v30 = vmul.f32 %v784_v24, %v2664_v54  ;;  %v791_v36 = vmul.f32 %v785_v25, %v2681_v56 }
 0x232   :  { %v792_v32 = vmul.f32 %v786_v26, %v786_v26  ;;  %v793_v33 = vmul.f32 %v787_v27, %v787_v27  ;;  %v794_v34 = vmul.f32 %v788_v28, %v788_v28  ;;  %v795_v35 = vmul.f32 %v789_v29, %v789_v29 }
 0x233   :  { %v796_v45 = vmul.f32 %v790_v30, %v790_v30  ;;  %v797_v44 = vmul.f32 %v791_v36, %v791_v36 }
 0x234   :  { %v798_v37 = vsel %vm81_vm3, %v792_v32, 0.0  ;;  %v799_v38 = vsel %vm81_vm3, %v793_v33, 0.0  ;;  %v801_v46 = vsel %vm81_vm3, %v794_v34, 0.0  ;;  %v803_v48 = vsel %vm81_vm3, %v795_v35, 0.0 }
 0x235   :  { %v800_v42 = vadd.f32 %v799_v38, %v798_v37  ;;  %v805_v50 = vsel %vm81_vm3, %v796_v45, 0.0  ;;  %v807_v52 = vsel %vm774_vm1, %v797_v44, 0.0 }
 0x237   :  { %v802_v47 = vadd.f32 %v801_v46, %v800_v42 }
 0x239   :  { %v804_v49 = vadd.f32 %v803_v48, %v802_v47 }
 0x23b   :  { %v806_v51 = vadd.f32 %v805_v50, %v804_v49 }
 0x23d   :  { %v808_v55 = vadd.f32 %v807_v52, %v806_v51 }
 0x23f   :  { %809 = vadd.xlane.f32.xlu0 %v808_v55 }
 0x255   :  { %822 = vperm.xlu0 %2261, %v725_v61  }
 0x2cc   :  { %v810_v58 = vpop.xlane.xlu0 %809 }
 0x2cd   :  { %v811_v5 = vmul.f32 0.001953125, %v810_v58 }
 0x2cf   :  { %v812_v2 = vadd.f32 1e-05, %v811_v5 }
 0x2d1   :  { %2334 = vrsqrt.f32 %v812_v2 }
 0x2d4   :  { %v823_v6 = vpop.permute.xlu0 %822 }
 0x2db   :  { %v2335_v3 = vpop.eup %2334 }
 0x2dc   :  { %v814_v7 = vmul.f32 %v2335_v3, %v780_v20  ;;  %v815_v8 = vmul.f32 %v2335_v3, %v781_v21  ;;  %v816_v10 = vmul.f32 %v2335_v3, %v782_v22  ;;  %v817_v11 = vmul.f32 %v2335_v3, %v783_v23 }
 0x2dd   :  { %v818_v0 = vmul.f32 %v2335_v3, %v784_v24  ;;  %v819_v12 = vmul.f32 %v2335_v3, %v785_v25 }
 0x2de   :  { %v825_v14 = vmul.f32 %v823_v6, %v814_v7  ;;  %v826_v4 = vmul.f32 %v823_v6, %v815_v8  ;;  %v827_v15 = vmul.f32 %v823_v6, %v816_v10  ;;  %v828_v62 = vmul.f32 %v823_v6, %v817_v11 }
 0x2df   :  { %v829_v16 = vmul.f32 %v823_v6, %v818_v0  ;;  %v830_v17 = vmul.f32 %v823_v6, %v819_v12 }
 0x2e0   :  { %v836_v26 = vadd.f32 %v834_v13, %v825_v14  ;;  %v837_v27 = vadd.f32 %v834_v13, %v826_v4  ;;  %v838_v28 = vadd.f32 %v834_v13, %v827_v15  ;;  %v839_v29 = vadd.f32 %v834_v13, %v828_v62 }
 0x2e1   :  { %v840_v30 = vadd.f32 %v834_v13, %v829_v16  ;;  %v841_v32 = vadd.f32 %v834_v13, %v830_v17 }
 0x2e2   :  { %v842_v33 = vmax.f32 %v836_v26, 0.0  ;;  %v843_v20 = vmax.f32 %v837_v27, 0.0  ;;  %v844_v21 = vmax.f32 %v838_v28, 0.0  ;;  %v845_v22 = vmax.f32 %v839_v29, 0.0 }
 0x2e3   :  { %v846_v23 = vmax.f32 %v840_v30, 0.0  ;;  %v847_v24 = vmax.f32 %v841_v32, 0.0 }
 0x2e4   :  { %v848_v25 = vmul.f32 %v842_v33, %v2645_v39  ;;  %v849_v34 = vmul.f32 %v843_v20, %v2647_v40  ;;  %v850_v36 = vmul.f32 %v844_v21, %v2662_v53  ;;  %v851_v35 = vmul.f32 %v845_v22, %v2667_v57 }
 0x2e5   :  { %v852_v37 = vmul.f32 %v846_v23, %v2664_v54  ;;  %v853_v38 = vmul.f32 %v847_v24, %v2681_v56 }
 0x2e6   :  { %v2191_v42 = vpack.c.bf16 %v849_v34, %v848_v25  ;;  %v2192_v45 = vpack.c.bf16 %v851_v35, %v850_v36 }
 0x2e7   :  { %v2193_v46 = vpack.c.bf16 %v853_v38, %v852_v37 }
 0x2e8   :  { %v874_v44 = vrot.slane %v2191_v42, %v2448_v9  ;;  %v881_v48 = vrot.slane %v2192_v45, %v2448_v9 }
 0x2e9   :  { %v890_v49 = vrot.slane %v2193_v46, %v2448_v9 }
 0x2ea   :  { %v882_v50 = vcombine.low %v874_v44, %v881_v48  ;;  %v2338_v51 = vcombine.low %v881_v48, %v881_v48  ;;  %v2339_v16 = vcombine.low %v874_v44, %v874_v44 }
 0x2eb   :  { %895 = vst.msk [vmem:[#allocation3 + $0xa] sm:$0xf] %vm2725_vm15, %v890_v49 }
 0x2ec   :  { %893 = vst [vmem:[#allocation3 + $0x2] sm:$0xff] %v882_v50  ;;  %2197 = vst.sshfl [vmem:[#allocation2 + $0x30] sm:$0xf pattern:$0x76325410] %v882_v50  ;;  %v1143_v5 = vrot.slane %v882_v50, %v2448_v9  ;;  %v1190_v2 = vrot.slane %v2338_v51, %v2448_v9  ;;  %v1136_v17 = vrot.slane %v2339_v16, %v2448_v9 }
 0x2ed   :  { %2198 = vst.sshfl [vmem:[#allocation2 + $0x38] sm:$0xf pattern:$0x76325410] %v2338_v51 }
 0x2f2   :  { %v2199_v58 = vld.sshfl [vmem:[#allocation3 + $0xa] sm:$0x33 pattern:$0x76325410] }
 0x2f3   :  { %v2194_v52 = vld.sshfl [vmem:[#allocation3 + $0x8] sm:$0x33 pattern:$0x76325410]  ;;  %v1035_v55 = vld [vmem:[#allocation3] sm:$0xff] }
 0x2f4   :  { %926 = vrot.lane.b32.xlu1 %v2194_v52, %s2368_s22  ;;  %v1053_v61 = vrot.slane %v1035_v55, %v2448_v9  ;;  %1124 = vst.msk [vmem:[#allocation2 + $0x40] sm:$0x33] %vm2470_vm2, %v2199_v58  ;;  %v2292_v3 = vld [vmem:[#allocation3 + $0xa] ss:$0 sps:$4 sm:$0xff]   ;;  %v2293_v7 = vld [vmem:[#allocation3 + $0x8] ss:$0 sps:$4 sm:$0xff]   ;;  %v900_v0 = vcombine.high %v1035_v55, %v1035_v55  ;;  %v946_v14 = vcombine.low %v1035_v55, %v1035_v55 }
 0x2f5   :  { %v1151_v6 = vrot.slane %v2292_v3, %v2448_v9  ;;  %v1036_v8 = vld [vmem:[#allocation3 + $0x8] sm:$0x3f]  ;;  %v968_v10 = vrot.slane %v2293_v7, %v2448_v9 }
 0x2f6   :  { %1071 = vrot.lane.b32.xlu0 %v1053_v61, %s2370_s24  ;;  %v1054_v11 = vcombine.low %v1036_v8, %v1036_v8  ;;  %v914_v13 = vrot.slane %v900_v0, %v2448_v9  ;;  %v2297_v4 = vld [vmem:[#allocation3 + $0xa] ss:$0 sps:$4 sm:$0xff]   ;;  %v953_v15 = vrot.slane %v946_v14, %v2448_v9  ;;  %v1068_v26 = vrot.slane %v1036_v8, %v2448_v9 }
 0x2f7   :  { %v1244_v62 = vrot.slane %v2297_v4, %v2448_v9 }
 0x2f8   :  { %1019 = vrot.lane.b32.xlu1 %v2194_v52, %s2369_s23  ;;  %v1061_v12 = vrot.slane %v1054_v11, %v2448_v9 }
 0x2fa   :  { %1154 = vrot.lane.b32.xlu0 %v1143_v5, %s2371_s25 }
 0x2fc   :  { %922 = vrot.lane.b32.xlu1 %v1053_v61, %s2368_s22 }
 0x2fe   :  { %1247 = vrot.lane.b32.xlu0 %v1143_v5, %s2373_s14 }
 0x300   :  { %971 = vrot.lane.b32.xlu1 %v1053_v61, %s2367_s21 }
 0x302   :  { %1200 = vrot.lane.b32.xlu0 %v1190_v2, %s2372_s28 }
 0x304   :  { %1015 = vrot.lane.b32.xlu1 %v1053_v61, %s2369_s23 }
 0x306   :  { %1156 = vrot.lane.b32.xlu0 %v1151_v6, %s2371_s25 }
 0x308   :  { %1198 = vrot.lane.b32.xlu1 %v1143_v5, %s2372_s28 }
 0x30a   :  { %973 = vrot.lane.b32.xlu0 %v968_v10, %s2367_s21 }
 0x30c   :  { %1291 = vrot.lane.b32.xlu1 %v1143_v5, %s2374_s19 }
 0x30e   :  { %1073 = vrot.lane.b32.xlu0 %v1061_v12, %s2370_s24 }
 0x310   :  { %924 = vrot.lane.b32.xlu1 %v914_v13, %s2368_s22 }
 0x312   :  { %1293 = vrot.lane.b32.xlu0 %v1190_v2, %s2374_s19 }
 0x314   :  { %969 = vrot.lane.b32.xlu1 %v953_v15, %s2367_s21 }
 0x316   :  { %1249 = vrot.lane.b32.xlu0 %v1244_v62, %s2373_s14 }
 0x318   :  { %1017 = vrot.lane.b32.xlu1 %v914_v13, %s2369_s23 }
 0x31c   :  { %1069 = vrot.lane.b32.xlu1 %v953_v15, %s2370_s24 }
 0x320   :  { %1152 = vrot.lane.b32.xlu1 %v1136_v17, %s2371_s25 }
 0x324   :  { %1245 = vrot.lane.b32.xlu1 %v1136_v17, %s2373_s14 }
 0x328   :  { %1075 = vrot.lane.b32.xlu1 %v1068_v26, %s2370_s24 }
 0x32c   :  { %1202 = vrot.lane.b32.xlu1 %v2199_v58, %s2372_s28 }
 0x330   :  { %1295 = vrot.lane.b32.xlu1 %v2199_v58, %s2374_s19 }
 0x366   :  { %v927_v27 = vpop.permute.xlu1 %926 }
 0x367   :  { %v930_v28 = vrot.slane %v927_v27, 4 }
 0x368   :  { %v2772_v29 = vpop.permute.xlu0 %1071 }
 0x369   :  { %v935_v30 = vsel %vm83_vm5, %v927_v27, %v930_v28  ;;  %v1078_v6 = vrot.slane %v2772_v29, 4 }
 0x36a   :  { %941 = vst.msk [vmem:[#allocation2 + $0x10] sm:$0x33] %vm2470_vm2, %v935_v30  ;;  %v2777_v32 = vpop.permute.xlu1 %1019 }
 0x36b   :  { %v1023_v33 = vrot.slane %v2777_v32, 4 }
 0x36c   :  { %v2780_v20 = vpop.permute.xlu0 %1154 }
 0x36d   :  { %v1028_v21 = vsel %vm184_vm6, %v2777_v32, %v1023_v33  ;;  %v1159_v35 = vrot.slane %v2780_v20, 4 }
 0x36e   :  { %1034 = vst.msk [vmem:[#allocation2 + $0x28] sm:$0x33] %vm2470_vm2, %v1028_v21  ;;  %v923_v22 = vpop.permute.xlu1 %922 }
 0x36f   :  { %v928_v10 = vrot.slane %v923_v22, 4 }
 0x370   :  { %v2788_v23 = vpop.permute.xlu0 %1247 }
 0x372   :  { %v972_v24 = vpop.permute.xlu1 %971 }
 0x373   :  { %v976_v50 = vrot.slane %v972_v24, 4 }
 0x374   :  { %v2790_v25 = vpop.permute.xlu0 %1200 }
 0x375   :  { %v1205_v42 = vrot.slane %v2790_v25, 4 }
 0x376   :  { %v2792_v34 = vpop.permute.xlu1 %1015 }
 0x378   :  { %v1157_v36 = vpop.permute.xlu0 %1156 }
 0x379   :  { %v1160_v37 = vrot.slane %v1157_v36, 4 }
 0x37a   :  { %v1199_v38 = vpop.permute.xlu1 %1198 }
 0x37b   :  { %v1163_v45 = vsel %vm81_vm3, %v1159_v35, %v1160_v37  ;;  %v1165_v46 = vsel %vm323_vm8, %v1157_v36, %v1160_v37  ;;  %v1204_v44 = vrot.slane %v1199_v38, 4 }
 0x37c   :  { %v1164_v48 = vsel %vm323_vm8, %v2780_v20, %v1163_v45  ;;  %1171 = vst.msk [vmem:[#allocation2 + $0x40] sm:$0xcc] %vm2561_vm13, %v1165_v46  ;;  %v974_v49 = vpop.permute.xlu0 %973 }
 0x37d   :  { %1170 = vst [vmem:[#allocation2 + $0x38] sm:$0xcc] %v1164_v48  ;;  %v1207_v51 = vsel %vm81_vm3, %v1204_v44, %v1205_v42  ;;  %v977_v52 = vrot.slane %v974_v49, 4 }
 0x37e   :  { %v1208_v55 = vsel %vm370_vm9, %v1199_v38, %v1207_v51  ;;  %v1292_v61 = vpop.permute.xlu1 %1291  ;;  %v1021_v38 = vrot.slane %v2792_v34, 4 }
 0x37f   :  { %1215 = vst [vmem:[#allocation2 + $0x48] sm:$0x33] %v1208_v55  ;;  %v980_v58 = vsel %vm81_vm3, %v976_v50, %v977_v52  ;;  %v982_v5 = vsel %vm134_vm4, %v974_v49, %v977_v52  ;;  %v1297_v14 = vrot.slane %v1292_v61, 4 }
 0x380   :  { %v981_v2 = vsel %vm134_vm4, %v972_v24, %v980_v58  ;;  %988 = vst.msk [vmem:[#allocation2 + $0x10] sm:$0xcc] %vm2561_vm13, %v982_v5  ;;  %v2813_v3 = vpop.permute.xlu0 %1073  ;;  %v1252_v24 = vrot.slane %v2788_v23, 4 }
 0x381   :  { %987 = vst [vmem:[#allocation2 + $0x8] sm:$0xcc] %v981_v2  ;;  %v1079_v7 = vrot.slane %v2813_v3, 4 }
 0x382   :  { %v925_v8 = vpop.permute.xlu1 %924 }
 0x383   :  { %v1083_v11 = vsel %vm81_vm3, %v1078_v6, %v1079_v7  ;;  %v929_v0 = vrot.slane %v925_v8, 4 }
 0x384   :  { %v1084_v12 = vsel %vm242_vm7, %v2772_v29, %v1083_v11  ;;  %v2822_v13 = vpop.permute.xlu0 %1293 }
 0x385   :  { %1091 = vst [vmem:[#allocation2 + $0x20] sm:$0xcc] %v1084_v12  ;;  %v931_v4 = vsel %vm81_vm3, %v928_v10, %v929_v0  ;;  %v933_v15 = vsel %vm81_vm3, %v929_v0, %v930_v28  ;;  %v1298_v62 = vrot.slane %v2822_v13, 4 }
 0x386   :  { %v932_v16 = vsel %vm83_vm5, %v923_v22, %v931_v4  ;;  %v934_v17 = vsel %vm83_vm5, %v925_v8, %v933_v15  ;;  %v970_v26 = vpop.permute.xlu1 %969 }
 0x387   :  { %939 = vst [vmem:[#allocation2] sm:$0x33] %v932_v16  ;;  %940 = vst [vmem:[#allocation2 + $0x8] sm:$0x33] %v934_v17  ;;  %v1300_v27 = vsel %vm81_vm3, %v1297_v14, %v1298_v62  ;;  %v975_v29 = vrot.slane %v970_v26, 4 }
 0x388   :  { %v1301_v30 = vsel %vm465_vm14, %v1292_v61, %v1300_v27  ;;  %v1250_v21 = vpop.permute.xlu0 %1249 }
 0x389   :  { %1308 = vst [vmem:[#allocation2 + $0x60] sm:$0x33] %v1301_v30  ;;  %v978_v28 = vsel %vm81_vm3, %v975_v29, %v976_v50  ;;  %v1253_v36 = vrot.slane %v1250_v21, 4 }
 0x38a   :  { %v979_v22 = vsel %vm134_vm4, %v970_v26, %v978_v28  ;;  %v1018_v37 = vpop.permute.xlu1 %1017  ;;  %vm3054_vm4 = vcmask 293888  }
 0x38b   :  { %986 = vst [vmem:[#allocation2] sm:$0xcc] %v979_v22  ;;  %v1256_v45 = vsel %vm81_vm3, %v1252_v24, %v1253_v36  ;;  %v1258_v46 = vsel %vm418_vm10, %v1250_v21, %v1253_v36  ;;  %v1022_v44 = vrot.slane %v1018_v37, 4  ;;  %vm3055_vm5 = vmmov %vm3054_vm4 }
 0x38c   :  { %v1257_v48 = vsel %vm418_vm10, %v2788_v23, %v1256_v45  ;;  %1264 = vst.msk [vmem:[#allocation2 + $0x58] sm:$0xcc] %vm2561_vm13, %v1258_v46  ;;  %v1314_v46 = vld [vmem:[#allocation2 + $0x10] sm:$0xff] }
 0x38d   :  { %1263 = vst [vmem:[#allocation2 + $0x50] sm:$0xcc] %v1257_v48  ;;  %v1024_v49 = vsel %vm81_vm3, %v1021_v38, %v1022_v44  ;;  %v1026_v50 = vsel %vm81_vm3, %v1022_v44, %v1023_v33 }
 0x38e   :  { %v1025_v51 = vsel %vm184_vm6, %v2792_v34, %v1024_v49  ;;  %v1027_v52 = vsel %vm184_vm6, %v1018_v37, %v1026_v50  ;;  %v1070_v55 = vpop.permute.xlu1 %1069  ;;  %vm3056_vm6 = vmmov %vm3054_vm4 }
 0x38f   :  { %1032 = vst [vmem:[#allocation2 + $0x18] sm:$0x33] %v1025_v51  ;;  %1033 = vst [vmem:[#allocation2 + $0x20] sm:$0x33] %v1027_v52  ;;  %v1077_v61 = vrot.slane %v1070_v55, 4 }
 0x390   :  { %v1324_v29 = vld [vmem:[#allocation2 + $0x60] sm:$0x33] }
 0x391   :  { %v1081_v23 = vsel %vm81_vm3, %v1077_v61, %v1078_v6  ;;  %v2214_v28 = vcombine.high %v1324_v29, %v1324_v29  ;;  %v2213_v36 = vcombine.low %v1324_v29, %v1324_v29 }
 0x392   :  { %v1082_v58 = vsel %vm242_vm7, %v1070_v55, %v1081_v23  ;;  %v1153_v5 = vpop.permute.xlu1 %1152 }
 0x393   :  { %1090 = vst [vmem:[#allocation2 + $0x18] sm:$0xcc] %v1082_v58  ;;  %v1158_v2 = vrot.slane %v1153_v5, 4  ;;  %v1406_v37 = vsel %vm93_vm0, %v2213_v36, 0 }
 0x395   :  { %v1161_v32 = vsel %vm81_vm3, %v1158_v2, %v1159_v35 }
 0x396   :  { %v1162_v33 = vsel %vm323_vm8, %v1153_v5, %v1161_v32  ;;  %v1246_v34 = vpop.permute.xlu1 %1245  ;;  %v2298_v8 = vld [vmem:[#allocation2 + $0xc] ss:$24 sps:$4 sm:$0xff]   ;;  %v2300_v10 = vld [vmem:[#allocation2 + $0x8] ss:$24 sps:$4 sm:$0xff]  }
 0x397   :  { %1169 = vst [vmem:[#allocation2 + $0x30] sm:$0xcc] %v1162_v33  ;;  %v1251_v11 = vrot.slane %v1246_v34, 4  ;;  %1464 = vmatprep.subr.bf16.mxu0 %v2298_v8 }
 0x398   :  { %1465 = vmatpush1.bf16.msra.mxu0 %v2300_v10 }
 0x399   :  { %v1254_v0 = vsel %vm81_vm3, %v1251_v11, %v1252_v24 }
 0x39a   :  { %v1255_v6 = vsel %vm418_vm10, %v1246_v34, %v1254_v0  ;;  %v1076_v12 = vpop.permute.xlu1 %1075  ;;  %v2301_v14 = vld [vmem:[#allocation2 + $0x4] ss:$24 sps:$4 sm:$0xff]   ;;  %v2303_v4 = vld [vmem:[#allocation2] ss:$24 sps:$4 sm:$0xff]  }
 0x39b   :  { %1262 = vst [vmem:[#allocation2 + $0x48] sm:$0xcc] %v1255_v6  ;;  %v1080_v20 = vrot.slane %v1076_v12, 4  ;;  %1423 = vmatprep.subr.bf16.mxu1 %v2301_v14 }
 0x39c   :  { %1424 = vmatpush1.bf16.msra.mxu1 %v2303_v4 }
 0x39d   :  { %v1085_v35 = vsel %vm81_vm3, %v1079_v7, %v1080_v20 }
 0x39e   :  { %v1086_v15 = vsel %vm242_vm7, %v2813_v3, %v1085_v35  ;;  %v1203_v16 = vpop.permute.xlu1 %1202 }
 0x39f   :  { %1092 = vst.msk [vmem:[#allocation2 + $0x28] sm:$0xcc] %vm2561_vm13, %v1086_v15  ;;  %v1206_v17 = vrot.slane %v1203_v16, 4 }
 0x3a1   :  { %v1209_v26 = vsel %vm81_vm3, %v1205_v42, %v1206_v17  ;;  %v1211_v27 = vsel %vm370_vm9, %v1203_v16, %v1206_v17 }
 0x3a2   :  { %v1210_v30 = vsel %vm370_vm9, %v2790_v25, %v1209_v26  ;;  %1217 = vst.msk [vmem:[#allocation2 + $0x58] sm:$0x33] %vm2470_vm2, %v1211_v27  ;;  %v1296_v7 = vpop.permute.xlu1 %1295  ;;  %v2304_v3 = vld [vmem:[#allocation2 + $0x30] ss:$24 sps:$4 sm:$0xff]   ;;  %v2306_v21 = vld [vmem:[#allocation2 + $0x34] ss:$24 sps:$4 sm:$0xff]  }
 0x3a3   :  { %1216 = vst [vmem:[#allocation2 + $0x50] sm:$0x33] %v1210_v30  ;;  %v1299_v24 = vrot.slane %v1296_v7, 4  ;;  %1425 = vmatprep.subr.bf16.mxu1 %v2306_v21 }
 0x3a4   :  { %1426 = vmatpush1.bf16.msra.mxu1 %v2304_v3 }
 0x3a5   :  { %v1302_v42 = vsel %vm81_vm3, %v1298_v62, %v1299_v24  ;;  %v1304_v22 = vsel %vm465_vm14, %v1296_v7, %v1299_v24  ;;  %2219 = vmatprep.subr.msk.bf16.mxu1 %vm93_vm0, %v2214_v28  ;;  %v1311_v62 = vld [vmem:[%s3041_s6] sm:$0x3] }
 0x3a6   :  { %v1303_v25 = vsel %vm465_vm14, %v2822_v13, %v1302_v42  ;;  %1310 = vst.msk [vmem:[#allocation2 + $0x70] sm:$0x33] %vm2470_vm2, %v1304_v22  ;;  %v1317_v38 = vld [vmem:[#allocation2 + $0x28] sm:$0xff] }
 0x3a7   :  { %1309 = vst [vmem:[#allocation2 + $0x68] sm:$0x33] %v1303_v25  ;;  %v2309_v45 = vld [vmem:[#allocation2 + $0x14] ss:$24 sps:$4 sm:$0xff]   ;;  %v2205_v13 = vcombine.low %v1314_v46, %v1317_v38  ;;  %v1547_v38 = vld [vmem:[%s3043_s8] sm:$0xf] }
 0x3a8   :  { %1428 = vmatpush1.bf16.msra.mxu1 %v1406_v37  ;;  %v712_v37 = vld [vmem:[%s3040_s5] sm:$0xf] }
 0x3a9   :  { %1505 = vmatprep.subr.bf16.mxu1 %v2309_v45  ;;  %v2316_v49 = vld [vmem:[#allocation2 + $0x44] ss:$24 sps:$4 sm:$0xff]   ;;  %v2314_v52 = vld [vmem:[#allocation2 + $0x40] ss:$24 sps:$4 sm:$0xff]  }
 0x3aa   :  { %v2311_v44 = vld [vmem:[#allocation2 + $0x38] ss:$24 sps:$4 sm:$0xff]   ;;  %v2313_v48 = vld [vmem:[#allocation2 + $0x3c] ss:$24 sps:$4 sm:$0xff]  }
 0x3ab   :  { %2220 = vmatmul.mubr.msk.bf16.vlgmr.msra.gmra.mrb[4].mxu1 %vm3054_vm4, %v1311_v62  ;;  %1466 = vmatprep.subr.bf16.mxu0 %v2313_v48 }
 0x3ac   :  { %1467 = vmatpush1.bf16.msra.mxu0 %v2311_v44  ;;  %1506 = vmatpush1.bf16.msra.mxu1 %v2205_v13 }
 0x3ad   :  { %v1326_v50 = vld [vmem:[#allocation2 + $0x70] sm:$0x33]  ;;  %1507 = vmatprep.subr.bf16.mxu1 %v2316_v49  ;;  %1537 = vmatprep.mubr.bf16.mxu1 %v2375_v31 }
 0x3ae   :  { %v1325_v51 = vld [vmem:[#allocation2 + $0x68] sm:$0x33]  ;;  %v2218_v23 = vcombine.high %v1326_v50, %v1326_v50  ;;  %v2217_v58 = vcombine.low %v1326_v50, %v1326_v50 }
 0x3af   :  { %v2216_v55 = vcombine.high %v1325_v51, %v1325_v51  ;;  %v2215_v61 = vcombine.low %v1325_v51, %v1325_v51 }
 0x3b0   :  { %1508 = vmatpush1.bf16.msra.mxu1 %v2314_v52  ;;  %v1418_v2 = vsel %vm93_vm0, %v2217_v58, 0 }
 0x3b1   :  { %2221 = vmatprep.subr.msk.bf16.mxu0 %vm93_vm0, %v2216_v55  ;;  %v1412_v5 = vsel %vm93_vm0, %v2215_v61, 0  ;;  %2223 = vmatprep.subr.msk.bf16.mxu1 %vm93_vm0, %v2218_v23  ;;  %vm1953_vm0 = vcmask 130048  }
 0x3b2   :  { %1469 = vmatpush1.bf16.msra.mxu0 %v1412_v5 }
 0x3b4   :  { %1510 = vmatpush1.bf16.msra.mxu1 %v1418_v2 }
 0x3b5   :  { %2222 = vmatmul.mubr.msk.bf16.vlgmr.msra.gmra.mrb[8].mxu0 %vm3055_vm5, %v1311_v62 }
 0x3b6   :  { %1992 = vmatprep.mubr.bf16.mxu0 %v2375_v31 }
 0x3b7   :  { %2224 = vmatmul.mubr.msk.bf16.vlgmr.msra.gmra.mrb[8].mxu1 %vm3056_vm6, %v1311_v62 }
 0x3b8   :  { %2002 = vmatprep.mubr.bf16.mxu1 %v2375_v31 }
 0x47e   :  { %v1457_v32 = vpop.f32.mrb[4].mxu1 }
 0x47f   :  { %v1548_v33 = vmul.f32 %v1457_v32, %v2645_v39  ;;  %v1459_v34 = vpop.f32.mrb[5].mxu1 }
 0x480   :  { %v1549_v8 = vmul.f32 %v1459_v34, %v2647_v40  ;;  %v1461_v10 = vpop.f32.mrb[6].mxu1 }
 0x481   :  { %v1554_v11 = vsel %vm81_vm3, %v1548_v33, 0.0  ;;  %v1462_v0 = vpop.f32.mrb[7].mxu1 }
 0x482   :  { %v1555_v6 = vsel %vm81_vm3, %v1549_v8, 0.0 }
 0x483   :  { %v1556_v12 = vadd.f32 %v1555_v6, %v1554_v11 }
 0x488   :  { %v1498_v14 = vpop.f32.mrb[8].mxu0 }
 0x489   :  { %v1550_v4 = vmul.f32 %v1498_v14, %v2662_v53  ;;  %v1500_v20 = vpop.f32.mrb[9].mxu0 }
 0x48a   :  { %v1551_v35 = vmul.f32 %v1500_v20, %v2667_v57  ;;  %v1502_v15 = vpop.f32.mrb[10].mxu0  ;;  %v1539_v26 = vpop.f32.mrb[8].mxu1 }
 0x48b   :  { %v1557_v16 = vsel %vm81_vm3, %v1550_v4, 0.0  ;;  %v1503_v17 = vpop.f32.mrb[11].mxu0  ;;  %v1552_v30 = vmul.f32 %v1539_v26, %v2664_v54  ;;  %v1541_v7 = vpop.f32.mrb[9].mxu1 }
 0x48c   :  { %v1558_v27 = vadd.f32 %v1557_v16, %v1556_v12  ;;  %v1559_v29 = vsel %vm81_vm3, %v1551_v35, 0.0  ;;  %v1553_v3 = vmul.f32 %v1541_v7, %v2681_v56  ;;  %v1543_v21 = vpop.f32.mrb[10].mxu1  ;;  %v1546_v17 = vld [vmem:[%s3042_s7] sm:$0xf] }
 0x48d   :  { %v1561_v28 = vsel %vm81_vm3, %v1552_v30, 0.0  ;;  %v1544_v36 = vpop.f32.mrb[11].mxu1 }
 0x48e   :  { %v1560_v24 = vadd.f32 %v1559_v29, %v1558_v27  ;;  %v1563_v22 = vsel %vm774_vm1, %v1553_v3, 0.0 }
 0x490   :  { %v1562_v42 = vadd.f32 %v1561_v28, %v1560_v24 }
 0x492   :  { %v1564_v25 = vadd.f32 %v1563_v22, %v1562_v42 }
 0x494   :  { %1565 = vadd.xlane.f32.xlu0 %v1564_v25 }
 0x4aa   :  { %715 = vperm.xlu0 %2261, %v712_v37  }
 0x4ae   :  { %1621 = vperm.xlu0 %2261, %v1547_v38  }
 0x521   :  { %v1566_v45 = vpop.xlane.xlu0 %1565 }
 0x522   :  { %v1567_v46 = vmul.f32 0.001953125, %v1566_v45 }
 0x524   :  { %v1568_v62 = vsub.f32 %v1457_v32, %v1567_v46  ;;  %v1569_v44 = vsub.f32 %v1459_v34, %v1567_v46  ;;  %v1570_v48 = vsub.f32 %v1498_v14, %v1567_v46  ;;  %v1571_v13 = vsub.f32 %v1500_v20, %v1567_v46 }
 0x525   :  { %v1572_v49 = vsub.f32 %v1539_v26, %v1567_v46  ;;  %v1573_v50 = vsub.f32 %v1541_v7, %v1567_v46 }
 0x526   :  { %v1574_v51 = vmul.f32 %v1568_v62, %v2645_v39  ;;  %v1575_v52 = vmul.f32 %v1569_v44, %v2647_v40  ;;  %v1576_v55 = vmul.f32 %v1570_v48, %v2662_v53  ;;  %v1577_v61 = vmul.f32 %v1571_v13, %v2667_v57 }
 0x527   :  { %v1578_v23 = vmul.f32 %v1572_v49, %v2664_v54  ;;  %v1579_v32 = vmul.f32 %v1573_v50, %v2681_v56 }
 0x528   :  { %v1580_v58 = vmul.f32 %v1574_v51, %v1574_v51  ;;  %v1581_v5 = vmul.f32 %v1575_v52, %v1575_v52  ;;  %v1582_v2 = vmul.f32 %v1576_v55, %v1576_v55  ;;  %v1583_v33 = vmul.f32 %v1577_v61, %v1577_v61 }
 0x529   :  { %v1584_v11 = vmul.f32 %v1578_v23, %v1578_v23  ;;  %v1585_v12 = vmul.f32 %v1579_v32, %v1579_v32  ;;  %v716_v30 = vpop.permute.xlu0 %715 }
 0x52a   :  { %v1586_v34 = vsel %vm81_vm3, %v1580_v58, 0.0  ;;  %v1587_v8 = vsel %vm81_vm3, %v1581_v5, 0.0  ;;  %v1589_v0 = vsel %vm81_vm3, %v1582_v2, 0.0  ;;  %v1591_v14 = vsel %vm81_vm3, %v1583_v33, 0.0 }
 0x52b   :  { %v1588_v10 = vadd.f32 %v1587_v8, %v1586_v34  ;;  %v1593_v20 = vsel %vm81_vm3, %v1584_v11, 0.0  ;;  %v1595_v15 = vsel %vm774_vm1, %v1585_v12, 0.0  ;;  %v717_v7 = vrot.slane %v716_v30, 4 }
 0x52d   :  { %v1590_v6 = vadd.f32 %v1589_v0, %v1588_v10  ;;  %v719_v3 = vadd.f32 %v717_v7, %v2649_v41  ;;  %v720_v21 = vadd.f32 %v717_v7, %v2653_v43  ;;  %v721_v28 = vadd.f32 %v717_v7, %v2669_v59  ;;  %v1622_v59 = vpop.permute.xlu0 %1621 }
 0x52e   :  { %v722_v36 = vadd.f32 %v717_v7, %v2675_v63  ;;  %v723_v42 = vadd.f32 %v717_v7, %v2671_v60  ;;  %v724_v22 = vadd.f32 %v717_v7, %v2679_v1 }
 0x52f   :  { %v1592_v4 = vadd.f32 %v1591_v14, %v1590_v6  ;;  %v1636_v55 = vrot.slane %v719_v3, 4  ;;  %v1637_v41 = vrot.slane %v720_v21, 4  ;;  %v1638_v2 = vrot.slane %v721_v28, 4 }
 0x530   :  { %v1639_v60 = vrot.slane %v722_v36, 4 }
 0x531   :  { %v1594_v35 = vadd.f32 %v1593_v20, %v1592_v4 }
 0x533   :  { %v1596_v16 = vadd.f32 %v1595_v15, %v1594_v35 }
 0x535   :  { %1597 = vadd.xlane.f32.xlu1 %v1596_v16 }
 0x546   :  { %1610 = vperm.xlu1 %2262, %v1546_v17  }
 0x5c2   :  { %v1598_v26 = vpop.xlane.xlu1 %1597 }
 0x5c3   :  { %v1599_v27 = vmul.f32 0.001953125, %v1598_v26 }
 0x5c5   :  { %v1600_v29 = vadd.f32 1e-05, %v1599_v27 }
 0x5c6   :  { %v1611_v52 = vpop.permute.xlu1 %1610 }
 0x5c7   :  { %2336 = vrsqrt.f32 %v1600_v29 }
 0x5d1   :  { %v2337_v24 = vpop.eup %2336 }
 0x5d2   :  { %v1602_v25 = vmul.f32 %v2337_v24, %v1568_v62  ;;  %v1603_v37 = vmul.f32 %v2337_v24, %v1569_v44  ;;  %v1604_v38 = vmul.f32 %v2337_v24, %v1570_v48  ;;  %v1605_v45 = vmul.f32 %v2337_v24, %v1571_v13 }
 0x5d3   :  { %v1606_v46 = vmul.f32 %v2337_v24, %v1572_v49  ;;  %v1607_v51 = vmul.f32 %v2337_v24, %v1573_v50  ;;  %v1640_v49 = vrot.slane %v723_v42, 4  ;;  %v1641_v50 = vrot.slane %v724_v22, 4 }
 0x5d4   :  { %v1613_v61 = vmul.f32 %v1611_v52, %v1602_v25  ;;  %v1614_v43 = vmul.f32 %v1611_v52, %v1603_v37  ;;  %v1615_v23 = vmul.f32 %v1611_v52, %v1604_v38  ;;  %v1616_v58 = vmul.f32 %v1611_v52, %v1605_v45  ;;  %v1889_v25 = vld [vmem:[%s3045_s10] sm:$0xff]  ;;  %v1891_v38 = vld [vmem:[%s3045_s10 + $0x10] sm:$0xff]  ;;  %v1890_v45 = vld [vmem:[%s3045_s10 + $0x8] sm:$0xff] }
 0x5d5   :  { %v1617_v5 = vmul.f32 %v1611_v52, %v1606_v46  ;;  %v1618_v63 = vmul.f32 %v1611_v52, %v1607_v51  ;;  %v1892_v46 = vld [vmem:[%s3045_s10 + $0x18] sm:$0xff] }
 0x5d6   :  { %v1624_v32 = vadd.f32 %v1622_v59, %v1613_v61  ;;  %v1625_v1 = vadd.f32 %v1622_v59, %v1614_v43  ;;  %v1626_v62 = vadd.f32 %v1622_v59, %v1615_v23  ;;  %v1627_v44 = vadd.f32 %v1622_v59, %v1616_v58 }
 0x5d7   :  { %v1628_v48 = vadd.f32 %v1622_v59, %v1617_v5  ;;  %v1629_v13 = vadd.f32 %v1622_v59, %v1618_v63 }
 0x5d8   :  { %v1648_v33 = vadd.f32 %v1636_v55, %v1624_v32  ;;  %v1649_v34 = vadd.f32 %v1637_v41, %v1625_v1  ;;  %v1650_v8 = vadd.f32 %v1638_v2, %v1626_v62  ;;  %v1651_v10 = vadd.f32 %v1639_v60, %v1627_v44 }
 0x5d9   :  { %v1652_v11 = vadd.f32 %v1640_v49, %v1628_v48  ;;  %v1653_v0 = vadd.f32 %v1641_v50, %v1629_v13 }
 0x5da   :  { %v1654_v6 = vmax.f32 %v1648_v33, 0.0  ;;  %v1655_v12 = vmax.f32 %v1649_v34, 0.0  ;;  %v1656_v14 = vmax.f32 %v1650_v8, 0.0  ;;  %v1657_v4 = vmax.f32 %v1651_v10, 0.0 }
 0x5db   :  { %v1658_v20 = vmax.f32 %v1652_v11, 0.0  ;;  %v1659_v35 = vmax.f32 %v1653_v0, 0.0 }
 0x5dc   :  { %v1660_v15 = vmul.f32 %v1654_v6, %v2645_v39  ;;  %v1661_v16 = vmul.f32 %v1655_v12, %v2647_v40  ;;  %v1662_v17 = vmul.f32 %v1656_v14, %v2662_v53  ;;  %v1663_v26 = vmul.f32 %v1657_v4, %v2667_v57 }
 0x5dd   :  { %v1664_v27 = vmul.f32 %v1658_v20, %v2664_v54  ;;  %v1665_v29 = vmul.f32 %v1659_v35, %v2681_v56 }
 0x5de   :  { %v2225_v30 = vpack.c.bf16 %v1661_v16, %v1660_v15  ;;  %v2226_v7 = vpack.c.bf16 %v1663_v26, %v1662_v17  ;;  %v2326_v15 = vld [vmem:[%s3044_s9] sm:$0xff]   ;;  %v2327_v16 = vld [vmem:[%s3044_s9 + $0x8] sm:$0xff]   ;;  %s2376_s9 = smov [#allocation4]  }
 0x5df   :  { %v2227_v3 = vpack.c.bf16 %v1665_v29, %v1664_v27  ;;  %s2149_s26 = sshll.u32 %s2376_s9, 4  ;;  %s2150_s26 = int_to_ptr.vmem [resolvable:$true] %s2149_s26 }
 0x5e0   :  { %v1686_v21 = vrot.slane %v2225_v30, %v2448_v9  ;;  %v1693_v24 = vrot.slane %v2226_v7, %v2448_v9  ;;  %s2342_s0 = scalar_lea.vmem %s2150_s26, 3072  ;;  %p2347_p1 = scmp.lt.s32.totalorder %s2150_s26, %s2150_s26 }
 0x5e1   :  { %v1702_v28 = vrot.slane %v2227_v3, %v2448_v9  ;;  %p2343_p0 = scmp.ne.s32.totalorder %s2150_s26, %s2342_s0  ;;  %p2348_p2 = scmp.lt.s32.totalorder %s2342_s0, %s2342_s0 }
 0x5e2   :  { %v1694_v39 = vcombine.low %v1686_v21, %v1693_v24  ;;  %v2340_v53 = vcombine.low %v1693_v24, %v1693_v24  ;;  %v2341_v54 = vcombine.low %v1686_v21, %v1686_v21 }
 0x5e3   :  { %1706 = vst.msk [vmem:[#allocation3 + $0xa] sm:$0xf] %vm2725_vm15, %v1702_v28  ;;  %p2349_p3 = por %p2348_p2, %p2347_p1 }
 0x5e4   :  { %1705 = vst [vmem:[#allocation3 + $0x2] sm:$0xff] %v1694_v39  ;;  %v1797_v40 = vrot.slane %v1694_v39, %v2448_v9  ;;  %2229 = vst.sshfl [vmem:[#allocation2] sm:$0xf pattern:$0x76325410] %v1694_v39  ;;  %v1804_v57 = vrot.slane %v2340_v53, %v2448_v9  ;;  %v1750_v56 = vrot.slane %v2341_v54, %v2448_v9 }
 0x5e5   :  { %2230 = vst.sshfl [vmem:[#allocation2 + $0x8] sm:$0xf pattern:$0x76325410] %v2340_v53  ;;  %p2350_p4 = pnand %p2349_p3, %p2343_p0 }
 0x5e6   :  { %1812 = vrot.lane.b32.xlu1 %v1797_v40, %s2373_s14  ;;  %1768 = vrot.lane.b32.xlu0 %v1797_v40, %s2371_s25 }
 0x5ea   :  { %1814 = vrot.lane.b32.xlu0 %v1804_v57, %s2373_s14  ;;  %1766 = vrot.lane.b32.xlu1 %v1750_v56, %s2371_s25  ;;  %v2231_v47 = vld.sshfl [vmem:[#allocation3 + $0xa] sm:$0x33 pattern:$0x76325410] }
 0x5eb   :  { %1738 = vst.msk [vmem:[#allocation2 + $0x10] sm:$0x33] %vm2470_vm2, %v2231_v47  ;;  %v2321_v36 = vld [vmem:[#allocation3 + $0xa] ss:$0 sps:$4 sm:$0xff]  }
 0x5ec   :  { %v1765_v42 = vrot.slane %v2321_v36, %v2448_v9  ;;  %v2322_v22 = vld [vmem:[#allocation3 + $0xa] ss:$0 sps:$4 sm:$0xff]  }
 0x5ed   :  { %v1858_v37 = vrot.slane %v2322_v22, %v2448_v9 }
 0x5ee   :  { %1861 = vrot.lane.b32.xlu0 %v1797_v40, %s2374_s19  ;;  %1859 = vrot.lane.b32.xlu1 %v1750_v56, %s2374_s19 }
 0x5f2   :  { %1816 = vrot.lane.b32.xlu0 %v2231_v47, %s2373_s14  ;;  %1770 = vrot.lane.b32.xlu1 %v1765_v42, %s2371_s25 }
 0x5f6   :  { %1895 = vperm.xlu0 %2261, %v1889_v25   ;;  %1863 = vrot.lane.b32.xlu1 %v1858_v37, %s2374_s19 }
 0x5fa   :  { %1905 = vperm.xlu0 %2261, %v1891_v38   ;;  %1900 = vperm.xlu1 %2262, %v1890_v45  }
 0x5fe   :  { %1910 = vperm.xlu1 %2262, %v1892_v46  }
 0x658   :  { %v1813_v51 = vpop.permute.xlu1 %1812  ;;  %v1769_v9 = vpop.permute.xlu0 %1768 }
 0x659   :  { %v1818_v41 = vrot.slane %v1813_v51, 4  ;;  %v1773_v61 = vrot.slane %v1769_v9, 4 }
 0x65c   :  { %v1815_v52 = vpop.permute.xlu0 %1814  ;;  %v1767_v55 = vpop.permute.xlu1 %1766 }
 0x65d   :  { %v1819_v43 = vrot.slane %v1815_v52, 4  ;;  %v1772_v23 = vrot.slane %v1767_v55, 4 }
 0x65f   :  { %v1821_v58 = vsel %vm81_vm3, %v1818_v41, %v1819_v43  ;;  %v1775_v59 = vsel %vm81_vm3, %v1772_v23, %v1773_v61 }
 0x660   :  { %v1822_v5 = vsel %vm418_vm10, %v1813_v51, %v1821_v58  ;;  %v1776_v63 = vsel %vm323_vm8, %v1767_v55, %v1775_v59  ;;  %v1862_v2 = vpop.permute.xlu0 %1861  ;;  %v1860_v60 = vpop.permute.xlu1 %1859 }
 0x661   :  { %1829 = vst [vmem:[#allocation2 + $0x18] sm:$0x33] %v1822_v5  ;;  %1783 = vst [vmem:[#allocation2] sm:$0xcc] %v1776_v63  ;;  %v1866_v32 = vrot.slane %v1862_v2, 4  ;;  %v1865_v1 = vrot.slane %v1860_v60, 4 }
 0x663   :  { %v1868_v62 = vsel %vm81_vm3, %v1865_v1, %v1866_v32 }
 0x664   :  { %v1869_v44 = vsel %vm465_vm14, %v1860_v60, %v1868_v62  ;;  %v1817_v48 = vpop.permute.xlu0 %1816  ;;  %v1771_v13 = vpop.permute.xlu1 %1770 }
 0x665   :  { %1876 = vst [vmem:[#allocation2 + $0x18] sm:$0xcc] %v1869_v44  ;;  %v1820_v49 = vrot.slane %v1817_v48, 4  ;;  %v1774_v50 = vrot.slane %v1771_v13, 4 }
 0x667   :  { %v1823_v33 = vsel %vm81_vm3, %v1819_v43, %v1820_v49  ;;  %v1825_v34 = vsel %vm418_vm10, %v1817_v48, %v1820_v49  ;;  %v1777_v8 = vsel %vm81_vm3, %v1773_v61, %v1774_v50  ;;  %v1779_v10 = vsel %vm323_vm8, %v1771_v13, %v1774_v50 }
 0x668   :  { %v1824_v11 = vsel %vm418_vm10, %v1815_v52, %v1823_v33  ;;  %1831 = vst.msk [vmem:[#allocation2 + $0x28] sm:$0x33] %vm2470_vm2, %v1825_v34  ;;  %v1778_v0 = vsel %vm323_vm8, %v1769_v9, %v1777_v8  ;;  %v1864_v6 = vpop.permute.xlu1 %1863  ;;  %vm2124_vm2 = vcmask 64512  }
 0x669   :  { %1785 = vst.msk [vmem:[#allocation2 + $0x10] sm:$0xcc] %vm2561_vm13, %v1779_v10  ;;  %1830 = vst [vmem:[#allocation2 + $0x20] sm:$0x33] %v1824_v11  ;;  %v1867_v12 = vrot.slane %v1864_v6, 4 }
 0x66a   :  { %1784 = vst [vmem:[#allocation2 + $0x8] sm:$0xcc] %v1778_v0 }
 0x66b   :  { %v1870_v14 = vsel %vm81_vm3, %v1866_v32, %v1867_v12  ;;  %v1872_v4 = vsel %vm465_vm14, %v1864_v6, %v1867_v12 }
 0x66c   :  { %v1871_v20 = vsel %vm465_vm14, %v1862_v2, %v1870_v14  ;;  %1878 = vst.msk [vmem:[#allocation2 + $0x28] sm:$0xcc] %vm2561_vm13, %v1872_v4  ;;  %v2323_v19 = vld [vmem:[#allocation2] ss:$24 sps:$4 sm:$0xff]   ;;  %v2325_v35 = vld [vmem:[#allocation2 + $0x4] ss:$24 sps:$4 sm:$0xff]  }
 0x66d   :  { %1877 = vst [vmem:[#allocation2 + $0x20] sm:$0xcc] %v1871_v20  ;;  %1960 = vmatprep.subr.bf16.mxu0 %v2325_v35  ;;  %2246 = vmatprep.subr.bf16.mxu1 %v2325_v35 }
 0x66e   :  { %1961 = vmatpush1.bf16.msra.mxu0 %v2323_v19  ;;  %2247 = vmatpush1.bf16.msra.mxu1 %v2323_v19 }
 0x671   :  { %2240 = vmatmul.mubr.msk.bf16.vlgmr.msra.gmra.mrb[12].mxu0 %vm1953_vm0, %v2326_v15  ;;  %2241 = vmatmul.mubr.msk.bf16.vlgmr.msra.gmra.mrb[12].mxu1 %vm1953_vm0, %v2327_v16 }
 0x672   :  { %2045 = vmatprep.mubr.bf16.mxu1 %v2375_v31  ;;  %2098 = vmatprep.mubr.bf16.mxu0 %v2375_v31 }
 0x673   :  { %v2328_v18 = vld [vmem:[#allocation2 + $0x10] ss:$24 sps:$4 sm:$0xff]   ;;  %v2330_v17 = vld [vmem:[#allocation2 + $0x14] ss:$24 sps:$4 sm:$0xff]  }
 0x674   :  { %v2331_v26 = vld [vmem:[#allocation2 + $0x8] ss:$24 sps:$4 sm:$0xff]   ;;  %v2333_v27 = vld [vmem:[#allocation2 + $0xc] ss:$24 sps:$4 sm:$0xff]   ;;  %2066 = vmatprep.subr.bf16.mxu0 %v2330_v17 }
 0x675   :  { %2013 = vmatprep.subr.bf16.mxu1 %v2333_v27  ;;  %2067 = vmatpush1.bf16.msra.mxu0 %v2328_v18  ;;  %v1896_v29 = vpop.permute.xlu0 %1895 }
 0x676   :  { %2014 = vmatpush1.bf16.msra.mxu1 %v2331_v26 }
 0x679   :  { %2242 = vmatmul.mubr.msk.bf16.vlgmr.msra.gmra.mrb[16].mxu1 %vm1953_vm0, %v2326_v15  ;;  %2244 = vmatmul.mubr.msk.bf16.vlgmr.msra.gmra.mrb[16].mxu0 %vm1953_vm0, %v2326_v15  ;;  %v1901_v30 = vpop.permute.xlu1 %1900  ;;  %v1906_v7 = vpop.permute.xlu0 %1905 }
 0x67a   :  { %2055 = vmatprep.mubr.bf16.mxu1 %v2375_v31  ;;  %2108 = vmatprep.mubr.bf16.mxu0 %v2375_v31 }
 0x67d   :  { %v3011_v3 = vpop.permute.xlu1 %1910 }
 0x681   :  { %2243 = vmatmul.mubr.msk.bf16.gmra.mrb[20].mxu1 %vm1953_vm0, %v2327_v16  ;;  %2245 = vmatmul.mubr.msk.bf16.gmra.mrb[20].mxu0 %vm1953_vm0, %v2327_v16 }
 0x744   :  { %v1994_v21 = vpop.f32.mrb[12].mxu0  ;;  %v2004_v24 = vpop.f32.mrb[12].mxu1 }
 0x745   :  { %v1995_v28 = vadd.f32 %v1994_v21, %v1896_v29  ;;  %v2005_v39 = vadd.f32 %v2004_v24, %v1906_v7  ;;  %v1996_v40 = vpop.f32.mrb[13].mxu0  ;;  %v2006_v53 = vpop.f32.mrb[13].mxu1 }
 0x746   :  { %v1997_v54 = vadd.f32 %v1996_v40, %v1896_v29  ;;  %v2007_v57 = vadd.f32 %v2006_v53, %v1906_v7  ;;  %v1998_v56 = vpop.f32.mrb[14].mxu0  ;;  %v2008_v47 = vpop.f32.mrb[14].mxu1 }
 0x747   :  { %2119 = vst [vmem:[#allocation4] sm:$0xff] %v1995_v28  ;;  %2132 = vst [vmem:[#allocation4 + $0x60] sm:$0xff] %v2005_v39  ;;  %v1999_v31 = vadd.f32 %v1998_v56, %v1901_v30  ;;  %v2009_v36 = vadd.f32 %v2008_v47, %v3011_v3  ;;  %v2000_v42 = vpop.f32.mrb[15].mxu0  ;;  %v2010_v22 = vpop.f32.mrb[15].mxu1 }
 0x748   :  { %2120 = vst [vmem:[#allocation4 + $0x8] sm:$0xff] %v1997_v54  ;;  %2133 = vst [vmem:[#allocation4 + $0x68] sm:$0xff] %v2007_v57  ;;  %v2001_v25 = vadd.f32 %v2000_v42, %v1901_v30  ;;  %v2011_v37 = vadd.f32 %v2010_v22, %v3011_v3 }
 0x749   :  { %2126 = vst [vmem:[#allocation4 + $0x30] sm:$0xff] %v1999_v31  ;;  %2138 = vst [vmem:[#allocation4 + $0x90] sm:$0xff] %v2009_v36 }
 0x74a   :  { %2127 = vst [vmem:[#allocation4 + $0x38] sm:$0xff] %v2001_v25  ;;  %2139 = vst [vmem:[#allocation4 + $0x98] sm:$0xff] %v2011_v37 }
 0x74c   :  { %v2047_v38 = vpop.f32.mrb[16].mxu1  ;;  %v2100_v45 = vpop.f32.mrb[16].mxu0 }
 0x74d   :  { %v2048_v46 = vadd.f32 %v2047_v38, %v1896_v29  ;;  %v2101_v51 = vadd.f32 %v2100_v45, %v1896_v29  ;;  %v2049_v9 = vpop.f32.mrb[17].mxu1  ;;  %v2102_v52 = vpop.f32.mrb[17].mxu0 }
 0x74e   :  { %v2050_v55 = vadd.f32 %v2049_v9, %v1896_v29  ;;  %v2103_v41 = vadd.f32 %v2102_v52, %v1896_v29  ;;  %v2051_v61 = vpop.f32.mrb[18].mxu1  ;;  %v2104_v43 = vpop.f32.mrb[18].mxu0 }
 0x74f   :  { %2121 = vst [vmem:[#allocation4 + $0x10] sm:$0xff] %v2048_v46  ;;  %2123 = vst [vmem:[#allocation4 + $0x20] sm:$0xff] %v2101_v51  ;;  %v2052_v23 = vadd.f32 %v2051_v61, %v1901_v30  ;;  %v2105_v58 = vadd.f32 %v2104_v43, %v1901_v30  ;;  %v2053_v59 = vpop.f32.mrb[19].mxu1  ;;  %v2106_v5 = vpop.f32.mrb[19].mxu0 }
 0x750   :  { %2122 = vst [vmem:[#allocation4 + $0x18] sm:$0xff] %v2050_v55  ;;  %2125 = vst.msk [vmem:[#allocation4 + $0x28] sm:$0xff] %vm2124_vm2, %v2103_v41  ;;  %v2054_v63 = vadd.f32 %v2053_v59, %v1901_v30  ;;  %v2107_v2 = vadd.f32 %v2106_v5, %v1901_v30 }
 0x751   :  { %2128 = vst [vmem:[#allocation4 + $0x40] sm:$0xff] %v2052_v23  ;;  %2130 = vst [vmem:[#allocation4 + $0x50] sm:$0xff] %v2105_v58 }
 0x752   :  { %2129 = vst [vmem:[#allocation4 + $0x48] sm:$0xff] %v2054_v63  ;;  %2131 = vst.msk [vmem:[#allocation4 + $0x58] sm:$0xff] %vm2124_vm2, %v2107_v2 }
 0x754   :  { %v2057_v60 = vpop.f32.mrb[20].mxu1  ;;  %v2110_v32 = vpop.f32.mrb[20].mxu0 }
 0x755   :  { %v2058_v1 = vadd.f32 %v2057_v60, %v1906_v7  ;;  %v2111_v62 = vadd.f32 %v2110_v32, %v1906_v7  ;;  %v2059_v44 = vpop.f32.mrb[21].mxu1  ;;  %v2112_v48 = vpop.f32.mrb[21].mxu0 }
 0x756   :  { %v2060_v13 = vadd.f32 %v2059_v44, %v1906_v7  ;;  %v2113_v49 = vadd.f32 %v2112_v48, %v1906_v7  ;;  %v2061_v50 = vpop.f32.mrb[22].mxu1  ;;  %v2114_v33 = vpop.f32.mrb[22].mxu0 }
 0x757   :  { %2134 = vst [vmem:[#allocation4 + $0x70] sm:$0xff] %v2058_v1  ;;  %2136 = vst [vmem:[#allocation4 + $0x80] sm:$0xff] %v2111_v62  ;;  %v2062_v34 = vadd.f32 %v2061_v50, %v3011_v3  ;;  %v2115_v8 = vadd.f32 %v2114_v33, %v3011_v3  ;;  %v2063_v10 = vpop.f32.mrb[23].mxu1  ;;  %v2116_v11 = vpop.f32.mrb[23].mxu0 }
 0x758   :  { %2135 = vst [vmem:[#allocation4 + $0x78] sm:$0xff] %v2060_v13  ;;  %2137 = vst.msk [vmem:[#allocation4 + $0x88] sm:$0xff] %vm2124_vm2, %v2113_v49  ;;  %v2064_v0 = vadd.f32 %v2063_v10, %v3011_v3  ;;  %v2117_v6 = vadd.f32 %v2116_v11, %v3011_v3 }
 0x759   :  { %2140 = vst [vmem:[#allocation4 + $0xa0] sm:$0xff] %v2062_v34  ;;  %2142 = vst [vmem:[#allocation4 + $0xb0] sm:$0xff] %v2115_v8 }
 0x75a   :  { %2141 = vst [vmem:[#allocation4 + $0xa8] sm:$0xff] %v2064_v0  ;;  %2143 = vst.msk [vmem:[#allocation4 + $0xb8] sm:$0xff] %vm2124_vm2, %v2117_v6 }
 0x75b   :  { %2353 = shalt.err (!%p2350_p4)
}
 0x75c   :  { %s2354_s29 = scalar_lea.hbm %s3046_s11, 3072 }
 0x75d   :  { %p2355_p5 = scmp.ne.s32.totalorder %s3046_s11, %s2354_s29  ;;  %p2358_p6 = scmp.lt.u32.totalorder %s2354_s29, %s3046_s11 }
 0x75f   :  { %p2360_p7 = pnand %p2358_p6, %p2355_p5 }
 0x761   :  { %2363 = shalt.err (!%p2360_p7)
}
 0x762   :  { %s2377_s3 = smov 768   ;;  %s2378_s21 = smov 48  }
 0x763   :  { %2155 = dma.vmem_to_hbm [thread:$0]  %s2150_s26, 3072, %s3046_s11, [#allocation5], %s2377_s3, %s2377_s3, %s2378_s21  }
 0x764   :  { %2364 = dma.done.wait [#allocation5], 3072  }
 0x765   :  { %2365 = vsyncadd [#allocation5], 4294964224 }
 0x766   :  { %2159 = vsyncpa [#allocation5], 1 }

</bundles_post_ra>
